<compile_context>
chip_gen: v7x
topology: tpu7x:2x2x1
jax: 0.10.0
libtpu: 0.0.40
codegen_flags: <defaults>
</compile_context>

<pallas_src>
import typing as tp

import jax
import jax.numpy as jnp
from jax.experimental import pallas as pl
from jax.experimental.pallas import tpu as pltpu


def _round_up(x: int, m: int) -> int:
    return ((x + m - 1) // m) * m


# ----------------------------------------------------------------------------
# Pallas kernels:  o = (x @ W + b) * row_scale     (proj_out + attention mask)
# ----------------------------------------------------------------------------
def _linear_mask_kernel(x_ref, w_ref, b_ref, s_ref, o_ref):
    """Single-K-step body: no scratch, no init/finalize phases."""
    x = x_ref[...].astype(jnp.bfloat16)          # in-register cast, VPU
    acc = jnp.dot(x, w_ref[...], preferred_element_type=jnp.float32)
    o_ref[...] = ((acc + b_ref[...]) * s_ref[...]).astype(o_ref.dtype)


def _linear_mask_kernel_acc(x_ref, w_ref, b_ref, s_ref, o_ref, acc_ref):
    """K-tiled fallback (very large D): assign on k==0, accumulate afterwards."""
    k = pl.program_id(1)
    part = jnp.dot(x_ref[...].astype(jnp.bfloat16), w_ref[...],
                   preferred_element_type=jnp.float32)

    @pl.when(k == 0)
    def _():
        acc_ref[...] = part

    @pl.when(k > 0)
    def _():
        acc_ref[...] += part

    @pl.when(k == pl.num_programs(1) - 1)
    def _():
        o_ref[...] = ((acc_ref[...] + b_ref[...]) * s_ref[...]).astype(o_ref.dtype)


# ----------------------------------------------------------------------------
# Wrapper
# ----------------------------------------------------------------------------
def _vmem_budget_bytes() -> int:
    """Per-core VMEM capacity minus headroom for compiler-internal scratch."""
    cap = 64 * 2**20  # conservative default (v7x)
    try:
        info = pltpu.get_tpu_info()
        cap = int(getattr(info, "vmem_capacity_bytes", cap)) or cap
    except Exception:
        pass
    return max(cap - 16 * 2**20, 24 * 2**20)


def _ws_bytes(tile_m: int, tile_k: int, n_pad: int, out_bytes: int,
              k_steps: int) -> int:
    ws = 2 * tile_m * tile_k * 4          # x tile (f32, double-buffered)
    ws += 2 * tile_k * n_pad * 2          # weight tile (bf16)
    ws += 2 * 8 * n_pad * 4               # bias row (sublane-padded)
    ws += 2 * tile_m * 128 * 4            # mask column (lane-padded)
    ws += 2 * tile_m * n_pad * out_bytes  # output tile
    if k_steps > 1:
        ws += tile_m * n_pad * 4          # fp32 accumulator scratch
    return ws


def _choose_tile_m(M: int) -> int:
    m16 = _round_up(M, 16)
    if m16 <= 128:
        return m16                            # one small tile
    if m16 <= 512:
        return _round_up((m16 + 1) // 2, 16)  # 2 tiles on the parallel axis
    return 256                                # large M: MXU-filling 256-row tiles


def pallas_linear_mask(x: jax.Array, w_padded: jax.Array, b_padded: jax.Array,
                       row_scale: jax.Array, *, n_out: int,
                       out_dtype=jnp.float32) -> jax.Array:
    """(x @ W + b) * row_scale[:, None].

    x:          [M, D]   f32 activations (cast to bf16 inside the kernel)
    w_padded:   [D_pad, N_pad] bf16, pre-padded (D_pad >= D, N_pad mult of 128)
    b_padded:   [1, N_pad] f32, pre-padded
    row_scale:  [M] f32 attention-mask column
    Returns [M, n_out] in `out_dtype`.
    """
    M, D = x.shape
    D_pad, N_pad = w_padded.shape

    tile_m = _choose_tile_m(M)
    M_pad = _round_up(M, tile_m)

    out_bytes = jnp.dtype(out_dtype).itemsize
    budget = _vmem_budget_bytes()

    # Pick the K tiling: single step (full D) if the working set fits the
    # budget (it does for every listed T5 dim, even on v7x), else chunk K.
    candidates = [D_pad] + [c for c in (2048, 1024, 512) if c < D_pad]
    tile_k, D_run = None, D_pad
    for c in candidates:
        d_c = _round_up(D_pad, c)
        if _ws_bytes(tile_m, c, N_pad, out_bytes, d_c // c) <= budget:
            tile_k, D_run = c, d_c
            break
    if tile_k is None:
        tile_k = 512
        D_run = _round_up(D_pad, tile_k)
    k_steps = D_run // tile_k

    # Pad operands only when actually necessary (common case: no copies).
    xk = x
    if M_pad != M or D_run != D:
        xk = jnp.zeros((M_pad, D_run), x.dtype).at[:M, :D].set(x)
    sp = row_scale.reshape(M, 1).astype(jnp.float32)
    if M_pad != M:
        sp = jnp.zeros((M_pad, 1), jnp.float32).at[:M, :].set(sp)
    wk = w_padded
    if D_run != D_pad:
        wk = jnp.zeros((D_run, N_pad), jnp.bfloat16).at[:D_pad, :].set(w_padded)

    vmem_limit = int(min(
        budget,
        max(int(1.25 * _ws_bytes(tile_m, tile_k, N_pad, out_bytes, k_steps)),
            32 * 2**20)))

    if k_steps == 1:
        out = pl.pallas_call(
            _linear_mask_kernel,
            out_shape=jax.ShapeDtypeStruct((M_pad, N_pad), out_dtype),
            grid_spec=pltpu.PrefetchScalarGridSpec(
                num_scalar_prefetch=0,
                grid=(M_pad // tile_m,),
                in_specs=[
                    pl.BlockSpec((tile_m, tile_k), lambda i: (i, 0)),  # x
                    pl.BlockSpec((tile_k, N_pad), lambda i: (0, 0)),   # W (const)
                    pl.BlockSpec((1, N_pad), lambda i: (0, 0)),        # bias (const)
                    pl.BlockSpec((tile_m, 1), lambda i: (i, 0)),       # mask column
                ],
                out_specs=pl.BlockSpec((tile_m, N_pad), lambda i: (i, 0)),
            ),
            compiler_params=pltpu.CompilerParams(
                dimension_semantics=("parallel",),
                vmem_limit_bytes=vmem_limit),
        )(xk, wk, b_padded, sp)
    else:
        out = pl.pallas_call(
            _linear_mask_kernel_acc,
            out_shape=jax.ShapeDtypeStruct((M_pad, N_pad), out_dtype),
            grid_spec=pltpu.PrefetchScalarGridSpec(
                num_scalar_prefetch=0,
                grid=(M_pad // tile_m, k_steps),
                in_specs=[
                    pl.BlockSpec((tile_m, tile_k), lambda i, k: (i, k)),
                    pl.BlockSpec((tile_k, N_pad), lambda i, k: (k, 0)),
                    pl.BlockSpec((1, N_pad), lambda i, k: (0, 0)),
                    pl.BlockSpec((tile_m, 1), lambda i, k: (i, 0)),
                ],
                out_specs=pl.BlockSpec((tile_m, N_pad), lambda i, k: (i, 0)),
                scratch_shapes=[pltpu.VMEM((tile_m, N_pad), jnp.float32)],
            ),
            compiler_params=pltpu.CompilerParams(
                dimension_semantics=("parallel", "arbitrary"),
                vmem_limit_bytes=vmem_limit),
        )(xk, wk, b_padded, sp)

    if M_pad != M or N_pad != n_out:
        out = out[:M, :n_out]
    return out


# ----------------------------------------------------------------------------
# Conditioner / T5Conditioner (forward-pass semantics of the PyTorch module)
# ----------------------------------------------------------------------------
class Conditioner:
    def __init__(self, dim: int, output_dim: int, project_out: bool = False,
                 *, key: tp.Optional[jax.Array] = None):
        self.dim = dim
        self.output_dim = output_dim
        # nn.Linear(dim, output_dim) iff dim != output_dim or project_out.
        self.has_proj = (dim != output_dim) or project_out
        if self.has_proj:
            if key is None:
                key = jax.random.PRNGKey(0)
            k_w, k_b = jax.random.split(key)
            bound = 1.0 / (dim ** 0.5)  # torch nn.Linear default init
            w = jax.random.uniform(k_w, (dim, output_dim), jnp.float32,
                                   -bound, bound)
            b = jax.random.uniform(k_b, (output_dim,), jnp.float32,
                                   -bound, bound)
            self.proj_w = w.astype(jnp.bfloat16)   # [D, D_out] MXU operand
            self.proj_b = b                        # [D_out] f32
            # Pre-pad / pre-cast the constants ONCE (lane-dense N, 128-aligned
            # D) so no per-call padding/copies of the weight & bias.
            d_pad = _round_up(dim, 128)
            n_pad = _round_up(output_dim, 128)
            if d_pad != dim or n_pad != output_dim:
                self.proj_w_padded = jnp.zeros((d_pad, n_pad), jnp.bfloat16
                                               ).at[:dim, :output_dim].set(self.proj_w)
            else:
                self.proj_w_padded = self.proj_w
            if n_pad != output_dim:
                self.proj_b_padded = jnp.zeros((1, n_pad), jnp.float32
                                               ).at[0, :output_dim].set(b)
            else:
                self.proj_b_padded = b.reshape(1, output_dim)
        else:
            self.proj_w = None
            self.proj_b = None
            self.proj_w_padded = None
            self.proj_b_padded = None

    def __call__(self, x: tp.Any, device: tp.Any = None) -> tp.Any:
        raise NotImplementedError()


class T5Conditioner(Conditioner):
    T5_MODELS = ['t5-small', 't5-base', 't5-large', 't5-3b', 't5-11b',
                 'google/flan-t5-small', 'google/flan-t5-base',
                 'google/flan-t5-large', 'google/flan-t5-xl',
                 'google/flan-t5-xxl']
    T5_MODEL_DIMS = {'t5-small': 512, 't5-base': 768, 't5-large': 1024,
                     't5-3b': 1024, 't5-11b': 1024, 't5-xl': 2048,
                     't5-xxl': 4096, 'google/flan-t5-small': 512,
                     'google/flan-t5-base': 768, 'google/flan-t5-large': 1024,
                     'google/flan-t5-3b': 1024, 'google/flan-t5-11b': 1024,
                     'google/flan-t5-xl': 2048, 'google/flan-t5-xxl': 4096}

    def __init__(self, output_dim: int, t5_model_name: str = 't5-base',
                 max_length: int = 128, enable_grad: bool = False,
                 project_out: bool = False, *,
                 key: tp.Optional[jax.Array] = None):
        assert t5_model_name in self.T5_MODELS, \
            f'Unknown T5 model name: {t5_model_name}'
        super().__init__(self.T5_MODEL_DIMS[t5_model_name], output_dim,
                         project_out=project_out, key=key)
        self.t5_model_name = t5_model_name
        self.max_length = max_length
        self.enable_grad = enable_grad
        # TODO(synk): the pretrained HuggingFace T5EncoderModel + AutoTokenizer
        # have no Pallas equivalent (external weights / python tokenizer); a
        # deterministic stand-in tokenizer + embedding-table encoder is used so
        # the proj_out + mask hot path can run end-to-end.
        self._vocab = 512
        ek = jax.random.PRNGKey(42) if key is None else jax.random.fold_in(key, 7)
        self._embed_table = jax.random.normal(ek, (self._vocab, self.dim),
                                              jnp.float32)

    # ---- stand-in tokenizer (truncation + max_length padding, like HF) ----
    def _tokenize(self, texts: tp.List[str]):
        L = self.max_length
        ids, mask = [], []
        for t in texts:
            toks = [(ord(c) % (self._vocab - 1)) + 1 for c in t][:L]
            m = [True] * len(toks) + [False] * (L - len(toks))
            toks = toks + [0] * (L - len(toks))
            ids.append(toks)
            mask.append(m)
        return jnp.array(ids, jnp.int32), jnp.array(mask, jnp.bool_)

    # ---- stand-in frozen T5 encoder: embedding lookup -> [B, L, dim] ----
    def _encode(self, input_ids: jax.Array) -> jax.Array:
        return jnp.take(self._embed_table, input_ids, axis=0)

    def __call__(self, texts: tp.List[str], device: tp.Any = None):
        input_ids, attention_mask = self._tokenize(texts)
        embeddings = self._encode(input_ids).astype(jnp.float32)  # .float()
        B, L, D = embeddings.shape
        mask_f = attention_mask.astype(jnp.float32)
        if self.has_proj:
            y = pallas_linear_mask(embeddings.reshape(B * L, D),
                                   self.proj_w_padded, self.proj_b_padded,
                                   mask_f.reshape(B * L),
                                   n_out=self.output_dim)
            embeddings = y.reshape(B, L, self.output_dim)
        else:
            embeddings = embeddings * mask_f[..., None]
        return embeddings, attention_mask


# ----------------------------------------------------------------------------
if __name__ == "__main__":
    key = jax.random.PRNGKey(0)
    # t5-small: dim=512 -> output_dim=768 (dim != output_dim => Linear proj).
    cond = T5Conditioner(output_dim=768, t5_model_name='t5-small',
                         max_length=128, key=key)
    texts = ["a dog barking in the rain", "calm piano music"]

    emb, mask = cond(texts, device=None)
    jax.block_until_ready((emb, mask))

    # Pure-JAX reference along the same numerical path (bf16 operands, f32 acc).
    ids, am = cond._tokenize(texts)
    x = cond._encode(ids).astype(jnp.float32)
    B, L, D = x.shape
    ref = jnp.dot(x.astype(jnp.bfloat16).reshape(B * L, D), cond.proj_w,
                  preferred_element_type=jnp.float32) + cond.proj_b
    ref = ref.reshape(B, L, cond.output_dim) * am[..., None].astype(jnp.float32)

    assert emb.shape == (B, L, cond.output_dim), emb.shape
    assert mask.shape == (B, L), mask.shape
    assert bool(jnp.all(mask == am)), "attention mask mismatch"
    max_err = float(jnp.max(jnp.abs(emb - ref)))
    assert jnp.allclose(emb, ref, atol=1e-2, rtol=1e-2), \
        f"proj_out mismatch, max_err={max_err}"
    # Masked (padding) positions must be exactly zero.
    assert float(jnp.max(jnp.abs(jnp.where(am[..., None], 0.0, emb)))) == 0.0

    print("KERNEL_OK")
</pallas_src>

<mosaic_0001>
module attributes {stable_mosaic.version = 11 : i64} {
  func.func @_linear_mask_kernel(%arg0: i32, %arg1: memref<128x512xf32, #tpu.memory_space<vmem>>, %arg2: memref<512x768xbf16, #tpu.memory_space<vmem>>, %arg3: memref<1x768xf32, #tpu.memory_space<vmem>>, %arg4: memref<128x1xf32, #tpu.memory_space<vmem>>, %arg5: memref<128x768xf32, #tpu.memory_space<vmem>>) attributes {dimension_semantics = [#tpu.dimension_semantics<parallel>], iteration_bounds = array<i64: 2>, scalar_prefetch = 0 : i64, scratch_operands = 0 : i64, tpu.core_type = #tpu.core_type<tc>, window_params = [{transform_indices = @transform_0, window_bounds = array<i64: 128, 512>}, {pipeline_mode = #tpu.pipeline_mode<synchronous>, transform_indices = @transform_1, window_bounds = array<i64: 512, 768>}, {pipeline_mode = #tpu.pipeline_mode<synchronous>, transform_indices = @transform_2, window_bounds = array<i64: 1, 768>}, {transform_indices = @transform_3, window_bounds = array<i64: 128, 1>}, {transform_indices = @transform_4, window_bounds = array<i64: 128, 768>}]} {
    %c0 = arith.constant 0 : index
    %c0_0 = arith.constant 0 : index
    %0 = vector.load %arg1[%c0, %c0_0] : memref<128x512xf32, #tpu.memory_space<vmem>>, vector<128x512xf32>
    %1 = arith.truncf %0 : vector<128x512xf32> to vector<128x512xbf16>
    %c0_1 = arith.constant 0 : index
    %c0_2 = arith.constant 0 : index
    %2 = vector.load %arg2[%c0_1, %c0_2] : memref<512x768xbf16, #tpu.memory_space<vmem>>, vector<512x768xbf16>
    %cst = arith.constant dense<0.000000e+00> : vector<128x768xf32>
    %3 = tpu.matmul %1, %2, %cst {dimension_numbers = #tpu.dot_dimension_numbers<[1], [0], [0], [1], [0, 0, 1, 1], [], []>} : vector<128x512xbf16>, vector<512x768xbf16>, vector<128x768xf32> -> vector<128x768xf32>
    %c0_3 = arith.constant 0 : index
    %c0_4 = arith.constant 0 : index
    %4 = vector.load %arg3[%c0_3, %c0_4] : memref<1x768xf32, #tpu.memory_space<vmem>>, vector<1x768xf32>
    %5 = vector.broadcast %4 : vector<1x768xf32> to vector<128x768xf32>
    %6 = arith.addf %3, %5 : vector<128x768xf32>
    %c0_5 = arith.constant 0 : index
    %c0_6 = arith.constant 0 : index
    %7 = vector.load %arg4[%c0_5, %c0_6] : memref<128x1xf32, #tpu.memory_space<vmem>>, vector<128x1xf32>
    %8 = vector.broadcast %7 : vector<128x1xf32> to vector<128x768xf32>
    %9 = arith.mulf %6, %8 : vector<128x768xf32>
    %c0_7 = arith.constant 0 : index
    %c0_8 = arith.constant 0 : index
    %10 = vector.load %arg5[%c0_7, %c0_8] : memref<128x768xf32, #tpu.memory_space<vmem>>, vector<128x768xf32>
    tpu.vector_store %arg5[%c0_7, %c0_8], %9 {strides = array<i32>} : memref<128x768xf32, #tpu.memory_space<vmem>>, vector<128x768xf32>,
    return
  }
  func.func @transform_0(%arg0: i32) -> (i32, i32) {
    %c0_i32 = arith.constant 0 : i32
    %c0_i32_0 = arith.constant 0 : i32
    return %arg0, %c0_i32 : i32, i32
  }
  func.func @transform_1(%arg0: i32) -> (i32, i32) {
    %c0_i32 = arith.constant 0 : i32
    %c0_i32_0 = arith.constant 0 : i32
    %c0_i32_1 = arith.constant 0 : i32
    return %c0_i32, %c0_i32_0 : i32, i32
  }
  func.func @transform_2(%arg0: i32) -> (i32, i32) {
    %c0_i32 = arith.constant 0 : i32
    %c0_i32_0 = arith.constant 0 : i32
    %c0_i32_1 = arith.constant 0 : i32
    return %c0_i32, %c0_i32_0 : i32, i32
  }
  func.func @transform_3(%arg0: i32) -> (i32, i32) {
    %c0_i32 = arith.constant 0 : i32
    %c0_i32_0 = arith.constant 0 : i32
    return %arg0, %c0_i32 : i32, i32
  }
  func.func @transform_4(%arg0: i32) -> (i32, i32) {
    %c0_i32 = arith.constant 0 : i32
    %c0_i32_0 = arith.constant 0 : i32
    return %arg0, %c0_i32 : i32, i32
  }
}

</mosaic_0001>

<bundles_post_ra>
// kernel: tpu_custom_call.1
= control target key start
LH: loop header
LB: loop body
LE: loop exit
PB: predicated region body
PF: predicated region fallthrough
CT: control target
= control target key end

     0   :  { %9 = vsyncpa [#allocation3], 0  ;;  %s4351_s0 = inlined_call_operand.hbm [shape: f32[256,512], index: 0, kind: input, shape index: {}]   ;;  %s4352_s1 = inlined_call_operand.hbm [shape: bf16[512,768], index: 1, kind: input, shape index: {}]   ;;  %s4353_s2 = inlined_call_operand.vmem [shape: f32[1,768], index: 2, kind: input, shape index: {}]   ;;  %s4354_s3 = inlined_call_operand.vmem [shape: f32[256,1], index: 3, kind: input, shape index: {}]   ;;  %s4355_s4 = inlined_call_operand.hbm [shape: f32[256,768], index: 4, kind: output, shape index: {}]  }
   0x1   :  { %11 = vsyncpa [#allocation3 + $0x1], 0 }
   0x2   :  { %12 = vsyncpa [#allocation6], 0 }
   0x3   :  { %13 = vsyncpa [#allocation4], 0 }
   0x4   :  { %15 = vsyncpa [#allocation4 + $0x1], 0  ;;  %s3537_s15 = smov 0   ;;  %s3539_s16 = smov 0  }
   0x5   :  { %s3541_s17 = smov 0   ;;  %s3543_s18 = smov 0  }
   0x6 LB: > { %s3558_s19 = sadd.s32 4294967295, %s3500_s18   ;;  %s2612_s20 = sadd.s32 4294967294, %s3500_s18   ;;  %s3500_s18 = sphi %s3543_s18, %s4376_s18   ;;  %s3496_s17 = sphi %s3541_s17, %s4375_s17   ;;  %s3492_s16 = sphi %s3539_s16, %s4374_s16   ;;  %s3488_s15 = sphi %s3537_s15, %s4373_s15  }
   0x7   : > { %p41_p0 = scmp.ne.s32.totalorder %s3492_s16, %s3488_s15  ;;  %p4356_p1 = scmp.eq.s32.totalorder %s3558_s19, 0 }
   0x8   : > { %p139_p3 = scmp.eq.s32.totalorder %s2612_s20, 1  ;;  %p2613_p5 = scmp.ge.s32.totalorder %s3500_s18, 1 }
   0x9   : > { %p3567_p4 = por %p4356_p1, %p41_p0  ;;  %p146_p7 = scmp.lt.s32.totalorder %s3500_s18, 3 }
   0xa   : > { %p3572_p6 = por %p139_p3, %p41_p0  ;;  %s3502_s24 = smov [#allocation5]  }
   0xb   : > { %s4359_s21 = scalar_select %p3567_p4, 1, 0 }
   0xc   : > { %s4360_s22 = scalar_select %p3572_p6, 1, 0 }
   0xd   : > { %p3577_p8 = pnand %p2613_p5, %p146_p7  ;;  %s158_s25 = sshll.u32 %s3502_s24, 4  ;;  %s3581_s25 = int_to_ptr.vmem [resolvable:$true] %s158_s25 }
   0xe   : > { %s3593_s27 = sadd.s32 1, %s3500_s18   ;;  %s28_s28 = sadd.s32 1, %s3496_s17 }
   0xf   : > { %s4361_s23 = scalar_select %p3577_p8, 1, 0 }
  0x10   : > { %p3026_p9 = pneg %p3577_p8  ;;  %s25_s29 = ssub.s32 %s3500_s18, %s3593_s27 }
  0x11   : > { %s3372_s6 = scalar_lea.hbm %s4352_s1, 24576 }
  0x12   : > { %p3588_p11 = pnand %p3026_p9, %p4356_p1  ;;  %p3373_p12 = scmp.ne.s32.totalorder %s4352_s1, %s3372_s6 }
  0x13   : > { %p3379_p5 = scmp.lt.u32.totalorder %s3372_s6, %s4352_s1 }
  0x14   : > { %p3374_p13 = pneg %p3588_p11 }
  0x16   : > { %p3375_p0 = pnand %p3374_p13, %p3373_p12 }
  0x18   : > { %p3376_p3 = pneg %p3375_p0 }
  0x1a   : > { %p3381_p7 = pnand %p3379_p5, %p3376_p3 }
  0x1c   : > { %3384 = shalt.err (!%p3381_p7)
}
  0x1d   : > { %s3385_s11 = scalar_lea.vmem %s3581_s25, 24576  ;;  %p3393_p2 = scmp.lt.s32.totalorder %s3581_s25, %s3581_s25 }
  0x1e   : > { %p3386_p9 = scmp.ne.s32.totalorder %s3581_s25, %s3385_s11  ;;  %p3394_p6 = scmp.lt.s32.totalorder %s3385_s11, %s3385_s11 }
  0x20   : > { %p3388_p10 = pnand %p3386_p9, %p3374_p13  ;;  %p3395_p4 = por %p3394_p6, %p3393_p2 }
  0x22   : > { %p3389_p1 = pneg %p3388_p10 }
  0x24   : > { %p3396_p8 = pnand %p3395_p4, %p3389_p1 }
  0x26   : > { %3399 = shalt.err (!%p3396_p8)
}
  0x27   : > { %s3503_s12 = smov 384   ;;  %s3504_s13 = smov 24  }
  0x28   : > { %3029 = dma.hbm_to_vmem [thread:$0]  (!%p3588_p11), %s4352_s1, 24576, %s3581_s25, [#allocation6], %s3503_s12, %s3503_s12, %s3504_s13  }
  0x29   : > { %p26_p2 = scmp.eq.s32.totalorder %s25_s29, 0  ;;  %p35_p1 = scmp.ne.s32.totalorder %s3496_s17, %s3492_s16 }
  0x2a   : > { %p36_p4 = scmp.eq.s32.totalorder %s3500_s18, 0  ;;  %p3039_p6 = scmp.lt.s32.totalorder %s3500_s18, 2 }
  0x2b   : > { %s3624_s24 = scalar_select %p26_p2, %s3496_s17, %s28_s28  }
  0x2c   : > { %p37_p8 = por %p36_p4, %p35_p1  ;;  %p4363_p10 = scmp.eq.s32.totalorder %s3558_s19, 1 }
  0x2d   : > { %s175_s5 = sand.u32 1, %s3496_s17   ;;  %s2823_s6 = sshll.u32 %s3500_s18, 13 }
  0x2e   : > { %p3628_p12 = por %p4363_p10, %p35_p1  ;;  %s2616_s7 = sshll.u32 %s175_s5, 9 }
  0x2f   : > { %s3637_s9 = scalar_lea.hbm %s4351_s0, %s2823_s6  ;;  %s179_s25 = scalar_lea.vmem [#allocation2], %s2616_s7 }
  0x30   : > { %s187_s28 = sshll.u32 %s179_s25, 4  ;;  %p3639_p11 = pnand %p3039_p6, %p37_p8  ;;  %s3643_s28 = int_to_ptr.vmem [resolvable:$true] %s187_s28 }
  0x31   : > { %s3645_s10 = scalar_lea.sflag [#allocation3], %s175_s5  ;;  %s3400_s11 = scalar_lea.hbm %s3637_s9, 8192 }
  0x32   : > { %p3401_p13 = scmp.ne.s32.totalorder %s3637_s9, %s3400_s11  ;;  %p3402_p0 = pneg %p3639_p11 }
  0x33   : > { %s3405_s14 = scalar_lea.hbm %s4351_s0, 16384  ;;  %p3406_p7 = scmp.lt.u32.totalorder %s3637_s9, %s4351_s0 }
  0x34   : > { %p3403_p3 = pnand %p3402_p0, %p3401_p13  ;;  %p3407_p9 = scmp.lt.u32.totalorder %s3405_s14, %s3400_s11 }
  0x35   : > { %p3409_p1 = scmp.lt.u32.totalorder %s3400_s11, %s3637_s9 }
  0x36   : > { %p3404_p5 = pneg %p3403_p3  ;;  %p3408_p2 = por %p3407_p9, %p3406_p7 }
  0x38   : > { %p3410_p4 = por %p3409_p1, %p3408_p2 }
  0x3a   : > { %p3411_p6 = pnand %p3410_p4, %p3404_p5 }
  0x3c   : > { %3414 = shalt.err (!%p3411_p6)
}
  0x3d   : > { %s3415_s5 = scalar_lea.vmem %s3643_s28, 8192  ;;  %s3505_s7 = smov [#allocation2]  }
  0x3e   : > { %p3416_p8 = scmp.ne.s32.totalorder %s3643_s28, %s3415_s5  ;;  %s3420_s26 = sshll.u32 %s3505_s7, 4  ;;  %s3421_s26 = int_to_ptr.vmem [resolvable:$false] %s3420_s26 }
  0x3f   : > { %s3422_s8 = scalar_lea.vmem %s3421_s26, 16384  ;;  %p3423_p3 = scmp.lt.s32.totalorder %s3643_s28, %s3421_s26 }
  0x40   : > { %p3418_p10 = pnand %p3416_p8, %p3402_p0  ;;  %p3424_p7 = scmp.lt.s32.totalorder %s3422_s8, %s3415_s5 }
  0x42   : > { %p3419_p13 = pneg %p3418_p10  ;;  %p3425_p9 = por %p3424_p7, %p3423_p3 }
  0x44   : > { %p3426_p2 = pnand %p3425_p9, %p3419_p13 }
  0x46   : > { %3429 = shalt.err (!%p3426_p2)
}
  0x47   : > { %s3506_s25 = smov 512   ;;  %s3507_s11 = smov 32  }
  0x48   : > { %3033 = dma.hbm_to_vmem [thread:$0]  (!%p3639_p11), %s3637_s9, 8192, %s3643_s28, %s3645_s10, %s3506_s25, %s3506_s25, %s3507_s11  }
  0x49   : > { %p4366_p0 = scmp.ne.s32.totalorder %s4361_s23, 0 }
  0x4a   : > { %s3676_s12 = sand.u32 (!%p4366_p0), 1, %s3492_s16   ;;  %p4367_p5 = scmp.ne.s32.totalorder (!%p4366_p0), %s4359_s21, 0 }
  0x4b   : > { %208 = sbr.rel (%p4366_p0) target bundleno = 570 (0x23a), region = 36  ;;  %s2621_s13 = sshll.u32 (!%p4366_p0), %s3676_s12, 9 }
  0x4c   : > { %s211_s14 = scalar_lea.sflag (!%p4366_p0), [#allocation3], %s3676_s12  ;;  %s3680_s20 = scalar_lea.vmem (!%p4366_p0), [#allocation2], %s2621_s13 }
  0x52   : > { %3475 = dma.done.wait (%p4367_p5), %s211_s14, 8192  }
  0x53   : > { %3477 = vsyncadd (%p4367_p5), %s211_s14, 4294959104  ;;  %p4368_p11 = scmp.eq.s32.totalorder %s3558_s19, 0 }
  0x55   : > { %3479 = dma.done.wait (%p4368_p11), [#allocation6], 24576   ;;  %p4369_p1 = pmov %p4368_p11 }
  0x56   : > { %v3084_v0 = vld [vmem:[#allocation5 + $0x4] ss:$24 sps:$4 sm:$0xff]   ;;  %v3088_v2 = vld [vmem:[#allocation5] ss:$24 sps:$4 sm:$0xff]   ;;  %v3090_v4 = vld [vmem:[#allocation5 + $0x34] ss:$24 sps:$4 sm:$0xff]  }
  0x57   : > { %3481 = vsyncadd (%p4369_p1), [#allocation6], 4294942720  ;;  %v3086_v1 = vld [vmem:[#allocation5 + $0x304] ss:$24 sps:$4 sm:$0xff]   ;;  %1536 = vmatprep.subr.bf16.mxu1 %v3084_v0  ;;  %v3089_v3 = vld [vmem:[#allocation5 + $0x300] ss:$24 sps:$4 sm:$0xff]  }
  0x58   : > { %1649 = vmatprep.subr.bf16.mxu0 %v3086_v1  ;;  %1537 = vmatpush1.bf16.msra.mxu1 %v3088_v2  ;;  %v3092_v5 = vld [vmem:[#allocation5 + $0x334] ss:$24 sps:$4 sm:$0xff]   ;;  %v3094_v6 = vld [vmem:[#allocation5 + $0x30] ss:$24 sps:$4 sm:$0xff]   ;;  %v3096_v8 = vld [vmem:[#allocation5 + $0x64] ss:$24 sps:$4 sm:$0xff]  }
  0x59   : > { %1650 = vmatpush1.bf16.msra.mxu0 %v3089_v3  ;;  %1538 = vmatprep.subr.bf16.mxu1 %v3090_v4  ;;  %v3095_v7 = vld [vmem:[#allocation5 + $0x330] ss:$24 sps:$4 sm:$0xff]   ;;  %v3098_v9 = vld [vmem:[#allocation5 + $0x364] ss:$24 sps:$4 sm:$0xff]   ;;  %v3100_v10 = vld [vmem:[#allocation5 + $0x60] ss:$24 sps:$4 sm:$0xff]  }
  0x5a   : > { %1651 = vmatprep.subr.bf16.mxu0 %v3092_v5  ;;  %v3101_v11 = vld [vmem:[#allocation5 + $0x360] ss:$24 sps:$4 sm:$0xff]   ;;  %v3102_v12 = vld [vmem:[#allocation5 + $0x94] ss:$24 sps:$4 sm:$0xff]   ;;  %v3106_v14 = vld [vmem:[#allocation5 + $0x90] ss:$24 sps:$4 sm:$0xff]  }
  0x5b   : > { %v3104_v13 = vld [vmem:[#allocation5 + $0x394] ss:$24 sps:$4 sm:$0xff]   ;;  %v3107_v15 = vld [vmem:[#allocation5 + $0x390] ss:$24 sps:$4 sm:$0xff]   ;;  %v3108_v16 = vld [vmem:[#allocation5 + $0xc4] ss:$24 sps:$4 sm:$0xff]  }
  0x5c   : > { %1539 = vmatpush1.bf16.msra.mxu1 %v3094_v6  ;;  %v3110_v17 = vld [vmem:[#allocation5 + $0x3c4] ss:$24 sps:$4 sm:$0xff]   ;;  %v3112_v18 = vld [vmem:[#allocation5 + $0xc0] ss:$24 sps:$4 sm:$0xff]   ;;  %v3114_v20 = vld [vmem:[#allocation5 + $0xf4] ss:$24 sps:$4 sm:$0xff]  }
  0x5d   : > { %1652 = vmatpush1.bf16.msra.mxu0 %v3095_v7  ;;  %1540 = vmatprep.subr.bf16.mxu1 %v3096_v8  ;;  %v3113_v19 = vld [vmem:[#allocation5 + $0x3c0] ss:$24 sps:$4 sm:$0xff]   ;;  %v3116_v21 = vld [vmem:[#allocation5 + $0x3f4] ss:$24 sps:$4 sm:$0xff]   ;;  %v3118_v22 = vld [vmem:[#allocation5 + $0xf0] ss:$24 sps:$4 sm:$0xff]  }
  0x5e   : > { %1653 = vmatprep.subr.bf16.mxu0 %v3098_v9  ;;  %v3119_v23 = vld [vmem:[#allocation5 + $0x3f0] ss:$24 sps:$4 sm:$0xff]   ;;  %v3120_v24 = vld [vmem:[#allocation5 + $0x124] ss:$24 sps:$4 sm:$0xff]   ;;  %v3508_v26 = vmov 0   ;;  %s2623_s21 = sshll.u32 %s3558_s19, 4 }
  0x5f   : > { %v3122_v25 = vld [vmem:[#allocation5 + $0x424] ss:$24 sps:$4 sm:$0xff]   ;;  %3082 = vset.pattern.permute.xlu0 %v3508_v26  ;;  %3083 = vset.pattern.permute.xlu1 %v3508_v26  ;;  %v3124_v27 = vld [vmem:[#allocation5 + $0x120] ss:$24 sps:$4 sm:$0xff]   ;;  %v3126_v29 = vld [vmem:[#allocation5 + $0x154] ss:$24 sps:$4 sm:$0xff]  }
  0x60   : > { %1541 = vmatpush1.bf16.msra.mxu1 %v3100_v10  ;;  %v3125_v28 = vld [vmem:[#allocation5 + $0x420] ss:$24 sps:$4 sm:$0xff]   ;;  %v3128_v30 = vld [vmem:[#allocation5 + $0x454] ss:$24 sps:$4 sm:$0xff]   ;;  %v3130_v31 = vld [vmem:[#allocation5 + $0x150] ss:$24 sps:$4 sm:$0xff]  }
  0x61   : > { %1654 = vmatpush1.bf16.msra.mxu0 %v3101_v11  ;;  %1542 = vmatprep.subr.bf16.mxu1 %v3102_v12  ;;  %v3131_v32 = vld [vmem:[#allocation5 + $0x450] ss:$24 sps:$4 sm:$0xff]   ;;  %v3132_v33 = vld [vmem:[#allocation5 + $0x184] ss:$24 sps:$4 sm:$0xff]   ;;  %v3136_v35 = vld [vmem:[#allocation5 + $0x180] ss:$24 sps:$4 sm:$0xff]  }
  0x62   : > { %1655 = vmatprep.subr.bf16.mxu0 %v3104_v13  ;;  %v3134_v34 = vld [vmem:[#allocation5 + $0x484] ss:$24 sps:$4 sm:$0xff]   ;;  %v3137_v36 = vld [vmem:[#allocation5 + $0x480] ss:$24 sps:$4 sm:$0xff]   ;;  %v3138_v37 = vld [vmem:[#allocation5 + $0x1b4] ss:$24 sps:$4 sm:$0xff]  }
  0x63   : > { %v3140_v38 = vld [vmem:[#allocation5 + $0x4b4] ss:$24 sps:$4 sm:$0xff]   ;;  %v3142_v39 = vld [vmem:[#allocation5 + $0x1b0] ss:$24 sps:$4 sm:$0xff]   ;;  %v3144_v41 = vld [vmem:[#allocation5 + $0x1e4] ss:$24 sps:$4 sm:$0xff]  }
  0x64   : > { %1543 = vmatpush1.bf16.msra.mxu1 %v3106_v14  ;;  %v3143_v40 = vld [vmem:[#allocation5 + $0x4b0] ss:$24 sps:$4 sm:$0xff]   ;;  %v3146_v42 = vld [vmem:[#allocation5 + $0x4e4] ss:$24 sps:$4 sm:$0xff]   ;;  %v3148_v43 = vld [vmem:[#allocation5 + $0x1e0] ss:$24 sps:$4 sm:$0xff]  }
  0x65   : > { %1656 = vmatpush1.bf16.msra.mxu0 %v3107_v15  ;;  %1544 = vmatprep.subr.bf16.mxu1 %v3108_v16  ;;  %v3149_v44 = vld [vmem:[#allocation5 + $0x4e0] ss:$24 sps:$4 sm:$0xff]   ;;  %v3150_v45 = vld [vmem:[#allocation5 + $0x214] ss:$24 sps:$4 sm:$0xff]   ;;  %v3154_v51 = vld [vmem:[#allocation5 + $0x210] ss:$24 sps:$4 sm:$0xff]  }
  0x66   : > { %1657 = vmatprep.subr.bf16.mxu0 %v3110_v17  ;;  %v3152_v46 = vld [vmem:[#allocation5 + $0x514] ss:$24 sps:$4 sm:$0xff]   ;;  %v259_v49 = vld [vmem:[%s3680_s20 + $0x18] sm:$0xff]  ;;  %v3155_v52 = vld [vmem:[#allocation5 + $0x510] ss:$24 sps:$4 sm:$0xff]   ;;  %p3829_p4 = scmp.lt.s32.totalorder %s2623_s21, 31 }
  0x67   : > { %v257_v47 = vld [vmem:[%s3680_s20 + $0x8] sm:$0xff]  ;;  %v263_v50 = vld [vmem:[%s3680_s20 + $0x38] sm:$0xff]  ;;  %v256_v7 = vld [vmem:[%s3680_s20] sm:$0xff]  ;;  %s3016_s7 = smul.u32 768, %s3676_s12  ;;  %s2503_s14 = scalar_lea.sflag [#allocation4], %s3676_s12 }
  0x68   : > { %1545 = vmatpush1.bf16.msra.mxu1 %v3112_v18  ;;  %v261_v48 = vld [vmem:[%s3680_s20 + $0x28] sm:$0xff]  ;;  %v3156_v53 = vld [vmem:[#allocation5 + $0x244] ss:$24 sps:$4 sm:$0xff]   ;;  %v3696_v55 = vpack.c.bf16 %v263_v50, %v259_v49  ;;  %v3160_v57 = vld [vmem:[#allocation5 + $0x240] ss:$24 sps:$4 sm:$0xff]   ;;  %s4378_s21 = smov (!%p3829_p4, %s2623_s21), 31 }
  0x69   : > { %1658 = vmatpush1.bf16.msra.mxu0 %v3113_v19  ;;  %1546 = vmatprep.subr.bf16.mxu1 %v3114_v20  ;;  %v3694_v54 = vpack.c.bf16 %v261_v48, %v257_v47  ;;  %v3158_v56 = vld [vmem:[#allocation5 + $0x544] ss:$24 sps:$4 sm:$0xff]   ;;  %v3161_v58 = vld [vmem:[#allocation5 + $0x540] ss:$24 sps:$4 sm:$0xff]   ;;  %v3162_v59 = vld [vmem:[#allocation5 + $0x274] ss:$24 sps:$4 sm:$0xff]  }
  0x6a   : > { %1659 = vmatprep.subr.bf16.mxu0 %v3116_v21  ;;  %1681 = vmatprep.mubr.bf16.mxu0 %v3696_v55  ;;  %v3164_v60 = vld [vmem:[#allocation5 + $0x574] ss:$24 sps:$4 sm:$0xff]   ;;  %v3166_v61 = vld [vmem:[#allocation5 + $0x270] ss:$24 sps:$4 sm:$0xff]   ;;  %v3168_v63 = vld [vmem:[#allocation5 + $0x2a4] ss:$24 sps:$4 sm:$0xff]  }
  0x6b   : > { %1568 = vmatprep.mubr.bf16.mxu1 %v3694_v54  ;;  %v3167_v62 = vld [vmem:[#allocation5 + $0x570] ss:$24 sps:$4 sm:$0xff]   ;;  %v3170_v0 = vld [vmem:[#allocation5 + $0x5a4] ss:$24 sps:$4 sm:$0xff]   ;;  %v3172_v1 = vld [vmem:[#allocation5 + $0x2a0] ss:$24 sps:$4 sm:$0xff]  }
  0x6c   : > { %1547 = vmatpush1.bf16.msra.mxu1 %v3118_v22  ;;  %v3173_v2 = vld [vmem:[#allocation5 + $0x5a0] ss:$24 sps:$4 sm:$0xff]   ;;  %v3174_v3 = vld [vmem:[#allocation5 + $0x2d4] ss:$24 sps:$4 sm:$0xff]   ;;  %v3178_v5 = vld [vmem:[#allocation5 + $0x2d0] ss:$24 sps:$4 sm:$0xff]  }
  0x6d   : > { %1660 = vmatpush1.bf16.msra.mxu0 %v3119_v23  ;;  %1548 = vmatprep.subr.bf16.mxu1 %v3120_v24  ;;  %v3176_v4 = vld [vmem:[#allocation5 + $0x5d4] ss:$24 sps:$4 sm:$0xff]   ;;  %v3179_v6 = vld [vmem:[#allocation5 + $0x5d0] ss:$24 sps:$4 sm:$0xff]   ;;  %v260_v8 = vld [vmem:[%s3680_s20 + $0x20] sm:$0xff]  ;;  %s2624_s9 = sshll.u32 %s4378_s21, 3 }
  0x6e   : > { %1661 = vmatprep.subr.bf16.mxu0 %v3122_v25  ;;  %v258_v9 = vld [vmem:[%s3680_s20 + $0x10] sm:$0xff]  ;;  %v3182_v11 = vld [vmem:[#allocation5 + $0xc] ss:$24 sps:$4 sm:$0xff]   ;;  %v3180_v13 = vld [vmem:[#allocation5 + $0x8] ss:$24 sps:$4 sm:$0xff]   ;;  %v3706_v17 = vpack.c.bf16 %v260_v8, %v256_v7  ;;  %s3862_s10 = scalar_lea.vmem %s4354_s3, %s2624_s9  ;;  %s3974_s26 = scalar_lea.vmem [#allocation7], %s3016_s7 }
  0x6f   : > { %v262_v10 = vld [vmem:[%s3680_s20 + $0x30] sm:$0xff]  ;;  %v265_v15 = vld [vmem:[%s3680_s20 + $0x48] sm:$0xff]  ;;  %v267_v19 = vld [vmem:[%s3680_s20 + $0x58] sm:$0xff]  ;;  %s3017_s8 = smul.u32 12288, %s3558_s19  ;;  %s2517_s25 = sshll.u32 %s3974_s26, 4  ;;  %s4299_s25 = int_to_ptr.vmem [resolvable:$true] %s2517_s25 }
  0x70   : > { %1549 = vmatpush1.bf16.msra.mxu1 %v3124_v27  ;;  %v3185_v12 = vld [vmem:[#allocation5 + $0x14] ss:$24 sps:$4 sm:$0xff]   ;;  %v3183_v14 = vld [vmem:[#allocation5 + $0x10] ss:$24 sps:$4 sm:$0xff]   ;;  %v3708_v18 = vpack.c.bf16 %v262_v10, %v258_v9  ;;  %v271_v20 = vld [vmem:[%s3680_s20 + $0x78] sm:$0xff]  ;;  %s3509_s21 = smov [#allocation7]  }
  0x71   : > { %1662 = vmatpush1.bf16.msra.mxu0 %v3125_v28  ;;  %1550 = vmatprep.subr.bf16.mxu1 %v3126_v29  ;;  %v269_v16 = vld [vmem:[%s3680_s20 + $0x68] sm:$0xff]  ;;  %v3188_v21 = vld [vmem:[#allocation5 + $0x3c] ss:$24 sps:$4 sm:$0xff]   ;;  %v3186_v23 = vld [vmem:[#allocation5 + $0x38] ss:$24 sps:$4 sm:$0xff]   ;;  %v3714_v25 = vpack.c.bf16 %v271_v20, %v267_v19  ;;  %s4297_s13 = scalar_lea.hbm %s4355_s4, %s3017_s8  ;;  %s3434_s23 = sshll.u32 %s3509_s21, 4  ;;  %s3435_s23 = int_to_ptr.vmem [resolvable:$false] %s3434_s23 }
  0x72   : > { %1663 = vmatprep.subr.bf16.mxu0 %v3128_v30  ;;  %v3191_v22 = vld [vmem:[#allocation5 + $0x44] ss:$24 sps:$4 sm:$0xff]   ;;  %v3712_v24 = vpack.c.bf16 %v269_v16, %v265_v15  ;;  %v3189_v26 = vld [vmem:[#allocation5 + $0x40] ss:$24 sps:$4 sm:$0xff]   ;;  %v266_v29 = vld [vmem:[%s3680_s20 + $0x50] sm:$0xff]  ;;  %s3436_s9 = scalar_lea.vmem %s3435_s23, 24576  ;;  %p3437_p13 = scmp.lt.s32.totalorder %s4299_s25, %s3435_s23 }
  0x73   : > { %v264_v27 = vld [vmem:[%s3680_s20 + $0x40] sm:$0xff]  ;;  %v270_v30 = vld [vmem:[%s3680_s20 + $0x70] sm:$0xff]  ;;  %v291_v19 = vld [vmem:[%s3680_s20 + $0x118] sm:$0xff] }
  0x74   : > { %1551 = vmatpush1.bf16.msra.mxu1 %v3130_v31  ;;  %v268_v28 = vld [vmem:[%s3680_s20 + $0x60] sm:$0xff]  ;;  %v274_v49 = vld [vmem:[%s3680_s20 + $0x90] sm:$0xff]  ;;  %v295_v20 = vld [vmem:[%s3680_s20 + $0x138] sm:$0xff] }
  0x75   : > { %1664 = vmatpush1.bf16.msra.mxu0 %v3131_v32  ;;  %1552 = vmatprep.subr.bf16.mxu1 %v3132_v33  ;;  %v3194_v31 = vld [vmem:[#allocation5 + $0x6c] ss:$24 sps:$4 sm:$0xff]   ;;  %v3192_v33 = vld [vmem:[#allocation5 + $0x68] ss:$24 sps:$4 sm:$0xff]   ;;  %v278_v50 = vld [vmem:[%s3680_s20 + $0xb0] sm:$0xff] }
  0x76   : > { %1665 = vmatprep.subr.bf16.mxu0 %v3134_v34  ;;  %v3197_v32 = vld [vmem:[#allocation5 + $0x74] ss:$24 sps:$4 sm:$0xff]   ;;  %v3195_v34 = vld [vmem:[#allocation5 + $0x70] ss:$24 sps:$4 sm:$0xff]   ;;  %v272_v47 = vld [vmem:[%s3680_s20 + $0x80] sm:$0xff] }
  0x77   : > { %v276_v48 = vld [vmem:[%s3680_s20 + $0xa0] sm:$0xff]  ;;  %v282_v7 = vld [vmem:[%s3680_s20 + $0xd0] sm:$0xff] }
  0x78   : > { %1553 = vmatpush1.bf16.msra.mxu1 %v3136_v35  ;;  %v273_v35 = vld [vmem:[%s3680_s20 + $0x88] sm:$0xff]  ;;  %v286_v8 = vld [vmem:[%s3680_s20 + $0xf0] sm:$0xff] }
  0x79   : > { %1666 = vmatpush1.bf16.msra.mxu0 %v3137_v36  ;;  %1554 = vmatprep.subr.bf16.mxu1 %v3138_v37  ;;  %v277_v36 = vld [vmem:[%s3680_s20 + $0xa8] sm:$0xff]  ;;  %v3726_v37 = vpack.c.bf16 %v268_v28, %v264_v27  ;;  %v3768_v16 = vpack.c.bf16 %v286_v8, %v282_v7  ;;  %v3774_v27 = vpack.c.bf16 %v295_v20, %v291_v19  ;;  %v3225_v28 = vld [vmem:[#allocation5 + $0x160] ss:$24 sps:$4 sm:$0xff]  }
  0x7a   : > { %1667 = vmatprep.subr.bf16.mxu0 %v3140_v38  ;;  %v3728_v38 = vpack.c.bf16 %v270_v30, %v266_v29  ;;  %v3218_v9 = vld [vmem:[#allocation5 + $0x12c] ss:$24 sps:$4 sm:$0xff]   ;;  %v307_v7 = vld [vmem:[%s3680_s20 + $0x198] sm:$0xff] }
  0x7b   : > { %v3221_v10 = vld [vmem:[#allocation5 + $0x134] ss:$24 sps:$4 sm:$0xff]   ;;  %v288_v29 = vld [vmem:[%s3680_s20 + $0x100] sm:$0xff]  ;;  %v311_v8 = vld [vmem:[%s3680_s20 + $0x1b8] sm:$0xff] }
  0x7c   : > { %1555 = vmatpush1.bf16.msra.mxu1 %v3142_v39  ;;  %v275_v39 = vld [vmem:[%s3680_s20 + $0x98] sm:$0xff]  ;;  %v292_v30 = vld [vmem:[%s3680_s20 + $0x120] sm:$0xff] }
  0x7d   : > { %1668 = vmatpush1.bf16.msra.mxu0 %v3143_v40  ;;  %1556 = vmatprep.subr.bf16.mxu1 %v3144_v41  ;;  %v279_v40 = vld [vmem:[%s3680_s20 + $0xb8] sm:$0xff]  ;;  %v304_v19 = vld [vmem:[%s3680_s20 + $0x180] sm:$0xff] }
  0x7e   : > { %1669 = vmatprep.subr.bf16.mxu0 %v3146_v42  ;;  %v3200_v41 = vld [vmem:[#allocation5 + $0x9c] ss:$24 sps:$4 sm:$0xff]   ;;  %v308_v20 = vld [vmem:[%s3680_s20 + $0x1a0] sm:$0xff] }
  0x7f   : > { %v3203_v42 = vld [vmem:[#allocation5 + $0xa4] ss:$24 sps:$4 sm:$0xff]  }
  0x80   : > { %1557 = vmatpush1.bf16.msra.mxu1 %v3148_v43  ;;  %v3198_v43 = vld [vmem:[#allocation5 + $0x98] ss:$24 sps:$4 sm:$0xff]  }
  0x81   : > { %1670 = vmatpush1.bf16.msra.mxu0 %v3149_v44  ;;  %1558 = vmatprep.subr.bf16.mxu1 %v3150_v45  ;;  %v3732_v44 = vpack.c.bf16 %v277_v36, %v273_v35  ;;  %v3734_v45 = vpack.c.bf16 %v279_v40, %v275_v39  ;;  %v3228_v35 = vld [vmem:[#allocation5 + $0x188] ss:$24 sps:$4 sm:$0xff]  }
  0x82   : > { %1671 = vmatprep.subr.bf16.mxu0 %v3152_v46  ;;  %v3201_v46 = vld [vmem:[#allocation5 + $0xa0] ss:$24 sps:$4 sm:$0xff]   ;;  %v3231_v36 = vld [vmem:[#allocation5 + $0x190] ss:$24 sps:$4 sm:$0xff]  }
  0x83   : > { %v297_v39 = vld [vmem:[%s3680_s20 + $0x148] sm:$0xff] }
  0x84   : > { %1559 = vmatpush1.bf16.msra.mxu1 %v3154_v51  ;;  %v3206_v51 = vld [vmem:[#allocation5 + $0xcc] ss:$24 sps:$4 sm:$0xff]  }
  0x85   : > { %1672 = vmatpush1.bf16.msra.mxu0 %v3155_v52  ;;  %1560 = vmatprep.subr.bf16.mxu1 %v3156_v53  ;;  %v3209_v52 = vld [vmem:[#allocation5 + $0xd4] ss:$24 sps:$4 sm:$0xff]   ;;  %v3204_v53 = vld [vmem:[#allocation5 + $0xc8] ss:$24 sps:$4 sm:$0xff]  }
  0x86   : > { %1673 = vmatprep.subr.bf16.mxu0 %v3158_v56  ;;  %v3207_v56 = vld [vmem:[#allocation5 + $0xd0] ss:$24 sps:$4 sm:$0xff]  }
  0x87   : > { %v301_v40 = vld [vmem:[%s3680_s20 + $0x168] sm:$0xff] }
  0x88   : > { %1561 = vmatpush1.bf16.msra.mxu1 %v3160_v57  ;;  %v281_v57 = vld [vmem:[%s3680_s20 + $0xc8] sm:$0xff] }
  0x89   : > { %1674 = vmatpush1.bf16.msra.mxu0 %v3161_v58  ;;  %1562 = vmatprep.subr.bf16.mxu1 %v3162_v59  ;;  %v285_v58 = vld [vmem:[%s3680_s20 + $0xe8] sm:$0xff]  ;;  %v3746_v59 = vpack.c.bf16 %v276_v48, %v272_v47  ;;  %v3236_v47 = vld [vmem:[#allocation5 + $0x1bc] ss:$24 sps:$4 sm:$0xff]  }
  0x8a   : > { %1675 = vmatprep.subr.bf16.mxu0 %v3164_v60  ;;  %v3748_v60 = vpack.c.bf16 %v278_v50, %v274_v49  ;;  %v3239_v48 = vld [vmem:[#allocation5 + $0x1c4] ss:$24 sps:$4 sm:$0xff]   ;;  %v3234_v49 = vld [vmem:[#allocation5 + $0x1b8] ss:$24 sps:$4 sm:$0xff]   ;;  %v3792_v50 = vpack.c.bf16 %v301_v40, %v297_v39 }
  0x8b   : > { %v3260_v39 = vld [vmem:[#allocation5 + $0x27c] ss:$24 sps:$4 sm:$0xff]  }
  0x8c   : > { %1563 = vmatpush1.bf16.msra.mxu1 %v3166_v61  ;;  %v283_v61 = vld [vmem:[%s3680_s20 + $0xd8] sm:$0xff] }
  0x8d   : > { %1676 = vmatpush1.bf16.msra.mxu0 %v3167_v62  ;;  %1564 = vmatprep.subr.bf16.mxu1 %v3168_v63  ;;  %v287_v62 = vld [vmem:[%s3680_s20 + $0xf8] sm:$0xff] }
  0x8e   : > { %1677 = vmatprep.subr.bf16.mxu0 %v3170_v0  ;;  %v3212_v63 = vld [vmem:[#allocation5 + $0xfc] ss:$24 sps:$4 sm:$0xff]  }
  0x8f   : > { %v3215_v0 = vld [vmem:[#allocation5 + $0x104] ss:$24 sps:$4 sm:$0xff]  }
  0x90   : > { %1565 = vmatpush1.bf16.msra.mxu1 %v3172_v1  ;;  %v3210_v1 = vld [vmem:[#allocation5 + $0xf8] ss:$24 sps:$4 sm:$0xff]   ;;  %v3263_v40 = vld [vmem:[#allocation5 + $0x284] ss:$24 sps:$4 sm:$0xff]  }
  0x91   : > { %1678 = vmatpush1.bf16.msra.mxu0 %v3173_v2  ;;  %1566 = vmatprep.subr.bf16.mxu1 %v3174_v3  ;;  %v3752_v2 = vpack.c.bf16 %v285_v58, %v281_v57  ;;  %v3754_v3 = vpack.c.bf16 %v287_v62, %v283_v61  ;;  %v298_v57 = vld [vmem:[%s3680_s20 + $0x150] sm:$0xff]  ;;  %v3242_v61 = vld [vmem:[#allocation5 + $0x1ec] ss:$24 sps:$4 sm:$0xff]  }
  0x92   : > { %1679 = vmatprep.subr.bf16.mxu0 %v3176_v4  ;;  %v3213_v4 = vld [vmem:[#allocation5 + $0x100] ss:$24 sps:$4 sm:$0xff]   ;;  %v302_v58 = vld [vmem:[%s3680_s20 + $0x170] sm:$0xff] }
  0x93   : > { %v3245_v62 = vld [vmem:[#allocation5 + $0x1f4] ss:$24 sps:$4 sm:$0xff]  }
  0x94   : > { %1567 = vmatpush1.bf16.msra.mxu1 %v3178_v5  ;;  %v280_v5 = vld [vmem:[%s3680_s20 + $0xc0] sm:$0xff] }
  0x95   : > { %1680 = vmatpush1.bf16.msra.mxu0 %v3179_v6  ;;  %1762 = vmatprep.subr.bf16.mxu1 %v3182_v11  ;;  %v284_v6 = vld [vmem:[%s3680_s20 + $0xe0] sm:$0xff] }
  0x96   : > { %1988 = vmatprep.subr.bf16.mxu0 %v3185_v12  ;;  %v3216_v11 = vld [vmem:[#allocation5 + $0x128] ss:$24 sps:$4 sm:$0xff]   ;;  %v3766_v15 = vpack.c.bf16 %v284_v6, %v280_v5  ;;  %v3808_v6 = vpack.c.bf16 %v302_v58, %v298_v57  ;;  %v3266_v57 = vld [vmem:[#allocation5 + $0x2ac] ss:$24 sps:$4 sm:$0xff]  }
  0x97   : > { %1569 = vmatmul.mubr.bf16.vlgmr.msra.gmra.mrb[0].mxu1 %v3706_v17  ;;  %v3219_v12 = vld [vmem:[#allocation5 + $0x130] ss:$24 sps:$4 sm:$0xff]   ;;  %v3269_v58 = vld [vmem:[#allocation5 + $0x2b4] ss:$24 sps:$4 sm:$0xff]  }
  0x98   : > { %1682 = vmatmul.mubr.bf16.vlgmr.msra.gmra.mrb[0].mxu0 %v3708_v18  ;;  %1763 = vmatpush1.bf16.msra.mxu1 %v3180_v13  ;;  %v289_v13 = vld [vmem:[%s3680_s20 + $0x108] sm:$0xff] }
  0x99   : > { %1989 = vmatpush1.bf16.msra.mxu0 %v3183_v14  ;;  %1764 = vmatprep.subr.bf16.mxu1 %v3188_v21  ;;  %v293_v14 = vld [vmem:[%s3680_s20 + $0x128] sm:$0xff]  ;;  %v3224_v21 = vld [vmem:[#allocation5 + $0x15c] ss:$24 sps:$4 sm:$0xff]  }
  0x9a   : > { %1990 = vmatprep.subr.bf16.mxu0 %v3191_v22  ;;  %1578 = vmatprep.mubr.bf16.mxu1 %v3712_v24  ;;  %v3227_v22 = vld [vmem:[#allocation5 + $0x164] ss:$24 sps:$4 sm:$0xff]  }
  0x9b   : > { %1691 = vmatprep.mubr.bf16.mxu0 %v3714_v25 }
  0x9c   : > { %1765 = vmatpush1.bf16.msra.mxu1 %v3186_v23  ;;  %v3222_v23 = vld [vmem:[#allocation5 + $0x158] ss:$24 sps:$4 sm:$0xff]  }
  0x9d   : > { %1991 = vmatpush1.bf16.msra.mxu0 %v3189_v26  ;;  %1766 = vmatprep.subr.bf16.mxu1 %v3194_v31  ;;  %v3772_v26 = vpack.c.bf16 %v293_v14, %v289_v13  ;;  %v290_v31 = vld [vmem:[%s3680_s20 + $0x110] sm:$0xff]  ;;  %v3814_v14 = vpack.c.bf16 %v311_v8, %v307_v7  ;;  %v3273_v8 = vld [vmem:[#allocation5 + $0x2e0] ss:$24 sps:$4 sm:$0xff]  }
  0x9e   : > { %1992 = vmatprep.subr.bf16.mxu0 %v3197_v32  ;;  %v294_v32 = vld [vmem:[%s3680_s20 + $0x130] sm:$0xff] }
  0x9f   : > { %1579 = vmatmul.mubr.bf16.gmra.mrb[4].mxu1 %v3726_v37  ;;  %v3270_v7 = vld [vmem:[#allocation5 + $0x2d8] ss:$24 sps:$4 sm:$0xff]  }
  0xa0   : > { %1692 = vmatmul.mubr.bf16.gmra.mrb[4].mxu0 %v3728_v38  ;;  %1767 = vmatpush1.bf16.msra.mxu1 %v3192_v33  ;;  %v3230_v33 = vld [vmem:[#allocation5 + $0x18c] ss:$24 sps:$4 sm:$0xff]  }
  0xa1   : > { %1993 = vmatpush1.bf16.msra.mxu0 %v3195_v34  ;;  %1768 = vmatprep.subr.bf16.mxu1 %v3200_v41  ;;  %v3233_v34 = vld [vmem:[#allocation5 + $0x194] ss:$24 sps:$4 sm:$0xff]   ;;  %v3786_v41 = vpack.c.bf16 %v292_v30, %v288_v29  ;;  %v3252_v29 = vld [vmem:[#allocation5 + $0x248] ss:$24 sps:$4 sm:$0xff]  }
  0xa2   : > { %1994 = vmatprep.subr.bf16.mxu0 %v3203_v42  ;;  %1588 = vmatprep.mubr.bf16.mxu1 %v3732_v44  ;;  %v3788_v42 = vpack.c.bf16 %v294_v32, %v290_v31  ;;  %v3255_v30 = vld [vmem:[#allocation5 + $0x250] ss:$24 sps:$4 sm:$0xff]  }
  0xa3   : > { %1701 = vmatprep.mubr.bf16.mxu0 %v3734_v45  ;;  %v313_v31 = vld [vmem:[%s3680_s20 + $0x1c8] sm:$0xff] }
  0xa4   : > { %1769 = vmatpush1.bf16.msra.mxu1 %v3198_v43  ;;  %v299_v43 = vld [vmem:[%s3680_s20 + $0x158] sm:$0xff]  ;;  %v317_v32 = vld [vmem:[%s3680_s20 + $0x1e8] sm:$0xff] }
  0xa5   : > { %1995 = vmatpush1.bf16.msra.mxu0 %v3201_v46  ;;  %1770 = vmatprep.subr.bf16.mxu1 %v3206_v51  ;;  %v303_v46 = vld [vmem:[%s3680_s20 + $0x178] sm:$0xff] }
  0xa6   : > { %1996 = vmatprep.subr.bf16.mxu0 %v3209_v52  ;;  %v3794_v51 = vpack.c.bf16 %v303_v46, %v299_v43  ;;  %v3237_v52 = vld [vmem:[#allocation5 + $0x1c0] ss:$24 sps:$4 sm:$0xff]  }
  0xa7   : > { %1589 = vmatmul.mubr.bf16.gmra.mrb[8].mxu1 %v3746_v59  ;;  %v3258_v43 = vld [vmem:[#allocation5 + $0x278] ss:$24 sps:$4 sm:$0xff]  }
  0xa8   : > { %1702 = vmatmul.mubr.bf16.gmra.mrb[8].mxu0 %v3748_v60  ;;  %1771 = vmatpush1.bf16.msra.mxu1 %v3204_v53  ;;  %v296_v53 = vld [vmem:[%s3680_s20 + $0x140] sm:$0xff] }
  0xa9   : > { %1997 = vmatpush1.bf16.msra.mxu0 %v3207_v56  ;;  %1772 = vmatprep.subr.bf16.mxu1 %v3212_v63  ;;  %v300_v56 = vld [vmem:[%s3680_s20 + $0x160] sm:$0xff] }
  0xaa   : > { %1998 = vmatprep.subr.bf16.mxu0 %v3215_v0  ;;  %1598 = vmatprep.mubr.bf16.mxu1 %v3752_v2  ;;  %v3240_v63 = vld [vmem:[#allocation5 + $0x1e8] ss:$24 sps:$4 sm:$0xff]   ;;  %v3806_v5 = vpack.c.bf16 %v300_v56, %v296_v53  ;;  %v314_v53 = vld [vmem:[%s3680_s20 + $0x1d0] sm:$0xff] }
  0xab   : > { %1711 = vmatprep.mubr.bf16.mxu0 %v3754_v3  ;;  %v3243_v0 = vld [vmem:[#allocation5 + $0x1f0] ss:$24 sps:$4 sm:$0xff]   ;;  %v3261_v46 = vld [vmem:[#allocation5 + $0x280] ss:$24 sps:$4 sm:$0xff]  }
  0xac   : > { %1773 = vmatpush1.bf16.msra.mxu1 %v3210_v1  ;;  %v305_v1 = vld [vmem:[%s3680_s20 + $0x188] sm:$0xff]  ;;  %v318_v56 = vld [vmem:[%s3680_s20 + $0x1f0] sm:$0xff] }
  0xad   : > { %1999 = vmatpush1.bf16.msra.mxu0 %v3213_v4  ;;  %1774 = vmatprep.subr.bf16.mxu1 %v3218_v9  ;;  %v309_v4 = vld [vmem:[%s3680_s20 + $0x1a8] sm:$0xff]  ;;  %v3248_v9 = vld [vmem:[#allocation5 + $0x21c] ss:$24 sps:$4 sm:$0xff]  }
  0xae   : > { %2000 = vmatprep.subr.bf16.mxu0 %v3221_v10  ;;  %v3251_v10 = vld [vmem:[#allocation5 + $0x224] ss:$24 sps:$4 sm:$0xff]   ;;  %v3812_v13 = vpack.c.bf16 %v309_v4, %v305_v1 }
  0xaf   : > { %1599 = vmatmul.mubr.bf16.gmra.mrb[12].mxu1 %v3766_v15  ;;  %v3272_v1 = vld [vmem:[#allocation5 + $0x2dc] ss:$24 sps:$4 sm:$0xff]  }
  0xb0   : > { %1712 = vmatmul.mubr.bf16.gmra.mrb[12].mxu0 %v3768_v16  ;;  %1775 = vmatpush1.bf16.msra.mxu1 %v3216_v11  ;;  %v3246_v11 = vld [vmem:[#allocation5 + $0x218] ss:$24 sps:$4 sm:$0xff]   ;;  %v3275_v4 = vld [vmem:[#allocation5 + $0x2e4] ss:$24 sps:$4 sm:$0xff]  }
  0xb1   : > { %2001 = vmatpush1.bf16.msra.mxu0 %v3219_v12  ;;  %1776 = vmatprep.subr.bf16.mxu1 %v3224_v21  ;;  %v3249_v12 = vld [vmem:[#allocation5 + $0x220] ss:$24 sps:$4 sm:$0xff]   ;;  %v306_v21 = vld [vmem:[%s3680_s20 + $0x190] sm:$0xff] }
  0xb2   : > { %2002 = vmatprep.subr.bf16.mxu0 %v3227_v22  ;;  %1608 = vmatprep.mubr.bf16.mxu1 %v3772_v26  ;;  %v310_v22 = vld [vmem:[%s3680_s20 + $0x1b0] sm:$0xff] }
  0xb3   : > { %1721 = vmatprep.mubr.bf16.mxu0 %v3774_v27 }
  0xb4   : > { %1777 = vmatpush1.bf16.msra.mxu1 %v3222_v23  ;;  %v3254_v23 = vld [vmem:[#allocation5 + $0x24c] ss:$24 sps:$4 sm:$0xff]  }
  0xb5   : > { %2003 = vmatpush1.bf16.msra.mxu0 %v3225_v28  ;;  %1778 = vmatprep.subr.bf16.mxu1 %v3230_v33  ;;  %v3257_v28 = vld [vmem:[#allocation5 + $0x254] ss:$24 sps:$4 sm:$0xff]   ;;  %v3833_v33 = vpack.c.bf16 %v308_v20, %v304_v19  ;;  %v3279_v19 = vld [vmem:[#allocation5 + $0x310] ss:$24 sps:$4 sm:$0xff]  }
  0xb6   : > { %2004 = vmatprep.subr.bf16.mxu0 %v3233_v34  ;;  %v3835_v34 = vpack.c.bf16 %v310_v22, %v306_v21  ;;  %v3284_v20 = vld [vmem:[#allocation5 + $0x33c] ss:$24 sps:$4 sm:$0xff]  }
  0xb7   : > { %1609 = vmatmul.mubr.bf16.gmra.mrb[16].mxu1 %v3786_v41  ;;  %v2216_v21 = vld [vmem:[%s3862_s10 + $0x10] sm:$0xff]  ;;  %v3287_v22 = vld [vmem:[#allocation5 + $0x344] ss:$24 sps:$4 sm:$0xff]  }
  0xb8   : > { %1722 = vmatmul.mubr.bf16.gmra.mrb[16].mxu0 %v3788_v42  ;;  %1779 = vmatpush1.bf16.msra.mxu1 %v3228_v35  ;;  %v315_v35 = vld [vmem:[%s3680_s20 + $0x1d8] sm:$0xff] }
  0xb9   : > { %2005 = vmatpush1.bf16.msra.mxu0 %v3231_v36  ;;  %1780 = vmatprep.subr.bf16.mxu1 %v3236_v47  ;;  %v319_v36 = vld [vmem:[%s3680_s20 + $0x1f8] sm:$0xff]  ;;  %v3839_v47 = vpack.c.bf16 %v317_v32, %v313_v31  ;;  %v3293_v31 = vld [vmem:[#allocation5 + $0x374] ss:$24 sps:$4 sm:$0xff]   ;;  %v3288_v32 = vld [vmem:[#allocation5 + $0x368] ss:$24 sps:$4 sm:$0xff]  }
  0xba   : > { %2006 = vmatprep.subr.bf16.mxu0 %v3239_v48  ;;  %1618 = vmatprep.mubr.bf16.mxu1 %v3792_v50  ;;  %v3841_v48 = vpack.c.bf16 %v319_v36, %v315_v35  ;;  %v3296_v35 = vld [vmem:[#allocation5 + $0x39c] ss:$24 sps:$4 sm:$0xff]  }
  0xbb   : > { %1731 = vmatprep.mubr.bf16.mxu0 %v3794_v51  ;;  %2242 = vperm.xlu1 %3083, %v2216_v21   ;;  %v3299_v36 = vld [vmem:[#allocation5 + $0x3a4] ss:$24 sps:$4 sm:$0xff]  }
  0xbc   : > { %1781 = vmatpush1.bf16.msra.mxu1 %v3234_v49  ;;  %v312_v49 = vld [vmem:[%s3680_s20 + $0x1c0] sm:$0xff]  ;;  %v3332_v21 = vld [vmem:[#allocation5 + $0x4bc] ss:$24 sps:$4 sm:$0xff]  }
  0xbd   : > { %2007 = vmatpush1.bf16.msra.mxu0 %v3237_v52  ;;  %1782 = vmatprep.subr.bf16.mxu1 %v3242_v61  ;;  %v316_v52 = vld [vmem:[%s3680_s20 + $0x1e0] sm:$0xff]  ;;  %s3430_s20 = scalar_lea.vmem %s4299_s25, 12288 }
  0xbe   : > { %2008 = vmatprep.subr.bf16.mxu0 %v3245_v62  ;;  %v3855_v61 = vpack.c.bf16 %v316_v52, %v312_v49  ;;  %v3857_v62 = vpack.c.bf16 %v318_v56, %v314_v53  ;;  %v3305_v49 = vld [vmem:[#allocation5 + $0x3d4] ss:$24 sps:$4 sm:$0xff]   ;;  %v3300_v52 = vld [vmem:[#allocation5 + $0x3c8] ss:$24 sps:$4 sm:$0xff]   ;;  %v3311_v56 = vld [vmem:[#allocation5 + $0x404] ss:$24 sps:$4 sm:$0xff]   ;;  %p3431_p6 = scmp.ne.s32.totalorder %s4299_s25, %s3430_s20  ;;  %p3438_p3 = scmp.lt.s32.totalorder %s3436_s9, %s3430_s20 }
  0xbf   : > { %1619 = vmatmul.mubr.bf16.gmra.mrb[20].mxu1 %v3806_v5  ;;  %v3303_v53 = vld [vmem:[#allocation5 + $0x3d0] ss:$24 sps:$4 sm:$0xff]  }
  0xc0   : > { %1732 = vmatmul.mubr.bf16.gmra.mrb[20].mxu0 %v3808_v6  ;;  %1783 = vmatpush1.bf16.msra.mxu1 %v3240_v63  ;;  %v3264_v63 = vld [vmem:[#allocation5 + $0x2a8] ss:$24 sps:$4 sm:$0xff]   ;;  %p3432_p8 = pnand %p3431_p6, %p3628_p12  ;;  %p3439_p7 = por %p3438_p3, %p3437_p13 }
  0xc1   : > { %2009 = vmatpush1.bf16.msra.mxu0 %v3243_v0  ;;  %1784 = vmatprep.subr.bf16.mxu1 %v3248_v9  ;;  %v3267_v0 = vld [vmem:[#allocation5 + $0x2b0] ss:$24 sps:$4 sm:$0xff]   ;;  %v2214_v9 = vld [vmem:[%s3862_s10] sm:$0xff] }
  0xc2   : > { %2010 = vmatprep.subr.bf16.mxu0 %v3251_v10  ;;  %1628 = vmatprep.mubr.bf16.mxu1 %v3812_v13  ;;  %v3278_v10 = vld [vmem:[#allocation5 + $0x30c] ss:$24 sps:$4 sm:$0xff]   ;;  %p3433_p10 = pneg %p3432_p8 }
  0xc3   : > { %1741 = vmatprep.mubr.bf16.mxu0 %v3814_v14  ;;  %2232 = vperm.xlu0 %3082, %v2214_v9   ;;  %v3318_v9 = vld [vmem:[#allocation5 + $0x458] ss:$24 sps:$4 sm:$0xff]  }
  0xc4   : > { %1785 = vmatpush1.bf16.msra.mxu1 %v3246_v11  ;;  %v3281_v11 = vld [vmem:[#allocation5 + $0x314] ss:$24 sps:$4 sm:$0xff]   ;;  %p3440_p9 = pnand %p3439_p7, %p3433_p10 }
  0xc5   : > { %2011 = vmatpush1.bf16.msra.mxu0 %v3249_v12  ;;  %1786 = vmatprep.subr.bf16.mxu1 %v3254_v23  ;;  %v3276_v12 = vld [vmem:[#allocation5 + $0x308] ss:$24 sps:$4 sm:$0xff]   ;;  %v3282_v23 = vld [vmem:[#allocation5 + $0x338] ss:$24 sps:$4 sm:$0xff]  }
  0xc6   : > { %2012 = vmatprep.subr.bf16.mxu0 %v3257_v28  ;;  %v3285_v28 = vld [vmem:[#allocation5 + $0x340] ss:$24 sps:$4 sm:$0xff]  }
  0xc7   : > { %1629 = vmatmul.mubr.bf16.gmra.mrb[24].mxu1 %v3833_v33 }
  0xc8   : > { %1742 = vmatmul.mubr.bf16.gmra.mrb[24].mxu0 %v3835_v34  ;;  %1787 = vmatpush1.bf16.msra.mxu1 %v3252_v29  ;;  %v2215_v29 = vld [vmem:[%s3862_s10 + $0x8] sm:$0xff] }
  0xc9   : > { %2013 = vmatpush1.bf16.msra.mxu0 %v3255_v30  ;;  %1788 = vmatprep.subr.bf16.mxu1 %v3260_v39  ;;  %v2217_v30 = vld [vmem:[%s3862_s10 + $0x18] sm:$0xff] }
  0xca   : > { %2014 = vmatprep.subr.bf16.mxu0 %v3263_v40  ;;  %1638 = vmatprep.mubr.bf16.mxu1 %v3839_v47  ;;  %v3294_v39 = vld [vmem:[#allocation5 + $0x398] ss:$24 sps:$4 sm:$0xff]  }
  0xcb   : > { %1751 = vmatprep.mubr.bf16.mxu0 %v3841_v48  ;;  %2237 = vperm.xlu0 %3082, %v2215_v29   ;;  %v3297_v40 = vld [vmem:[#allocation5 + $0x3a0] ss:$24 sps:$4 sm:$0xff]   ;;  %v3338_v29 = vld [vmem:[#allocation5 + $0x4ec] ss:$24 sps:$4 sm:$0xff]  }
  0xcc   : > { %1789 = vmatpush1.bf16.msra.mxu1 %v3258_v43  ;;  %2247 = vperm.xlu1 %3083, %v2217_v30   ;;  %v2218_v43 = vld [vmem:[%s3862_s10 + $0x20] sm:$0xff]  ;;  %v3341_v30 = vld [vmem:[#allocation5 + $0x4f4] ss:$24 sps:$4 sm:$0xff]  }
  0xcd   : > { %2015 = vmatpush1.bf16.msra.mxu0 %v3261_v46  ;;  %1790 = vmatprep.subr.bf16.mxu1 %v3266_v57  ;;  %v2219_v46 = vld [vmem:[%s3862_s10 + $0x28] sm:$0xff]  ;;  %v3306_v57 = vld [vmem:[#allocation5 + $0x3f8] ss:$24 sps:$4 sm:$0xff]  }
  0xce   : > { %2016 = vmatprep.subr.bf16.mxu0 %v3269_v58  ;;  %v3309_v58 = vld [vmem:[#allocation5 + $0x400] ss:$24 sps:$4 sm:$0xff]  }
  0xcf   : > { %1639 = vmatmul.mubr.bf16.gmra.mrb[28].mxu1 %v3855_v61  ;;  %2252 = vperm.xlu0 %3082, %v2218_v43   ;;  %v3351_v43 = vld [vmem:[#allocation5 + $0x550] ss:$24 sps:$4 sm:$0xff]  }
  0xd0   : > { %1752 = vmatmul.mubr.bf16.gmra.mrb[28].mxu0 %v3857_v62  ;;  %1791 = vmatpush1.bf16.msra.mxu1 %v3264_v63  ;;  %v2220_v63 = vld [vmem:[%s3862_s10 + $0x30] sm:$0xff] }
  0xd1   : > { %2017 = vmatpush1.bf16.msra.mxu0 %v3267_v0  ;;  %1792 = vmatprep.subr.bf16.mxu1 %v3272_v1  ;;  %v3314_v0 = vld [vmem:[#allocation5 + $0x42c] ss:$24 sps:$4 sm:$0xff]  }
  0xd2   : > { %2018 = vmatprep.subr.bf16.mxu0 %v3275_v4  ;;  %1794 = vmatprep.mubr.bf16.mxu1 %v3694_v54  ;;  %v3317_v1 = vld [vmem:[#allocation5 + $0x434] ss:$24 sps:$4 sm:$0xff]   ;;  %v3312_v4 = vld [vmem:[#allocation5 + $0x428] ss:$24 sps:$4 sm:$0xff]  }
  0xd3   : > { %2020 = vmatprep.mubr.bf16.mxu0 %v3694_v54  ;;  %v3290_v54 = vld [vmem:[#allocation5 + $0x36c] ss:$24 sps:$4 sm:$0xff]   ;;  %2257 = vperm.xlu1 %3083, %v2219_v46   ;;  %v3356_v46 = vld [vmem:[#allocation5 + $0x57c] ss:$24 sps:$4 sm:$0xff]  }
  0xd4   : > { %1793 = vmatpush1.bf16.msra.mxu1 %v3270_v7  ;;  %2262 = vperm.xlu0 %3082, %v2220_v63   ;;  %v3320_v7 = vld [vmem:[#allocation5 + $0x45c] ss:$24 sps:$4 sm:$0xff]  }
  0xd5   : > { %2019 = vmatpush1.bf16.msra.mxu0 %v3273_v8  ;;  %1875 = vmatprep.subr.bf16.mxu1 %v3278_v10  ;;  %v3323_v8 = vld [vmem:[#allocation5 + $0x464] ss:$24 sps:$4 sm:$0xff]  }
  0xd6   : > { %2101 = vmatprep.subr.bf16.mxu0 %v3281_v11  ;;  %v2222_v10 = vld [vmem:[%s3862_s10 + $0x40] sm:$0xff]  ;;  %v2223_v11 = vld [vmem:[%s3862_s10 + $0x48] sm:$0xff]  ;;  %v3368_v63 = vld [vmem:[#allocation5 + $0x5dc] ss:$24 sps:$4 sm:$0xff]  }
  0xd7   : > { %1795 = vmatmul.mubr.bf16.vlgmr.msra.gmra.mrb[32].mxu1 %v3706_v17 }
  0xd8   : > { %2021 = vmatmul.mubr.bf16.vlgmr.msra.gmra.mrb[32].mxu0 %v3706_v17  ;;  %1876 = vmatpush1.bf16.msra.mxu1 %v3276_v12  ;;  %v3291_v17 = vld [vmem:[#allocation5 + $0x370] ss:$24 sps:$4 sm:$0xff]   ;;  %v3326_v12 = vld [vmem:[#allocation5 + $0x48c] ss:$24 sps:$4 sm:$0xff]  }
  0xd9   : > { %2102 = vmatpush1.bf16.msra.mxu0 %v3279_v19  ;;  %1877 = vmatprep.subr.bf16.mxu1 %v3284_v20  ;;  %v3329_v19 = vld [vmem:[#allocation5 + $0x494] ss:$24 sps:$4 sm:$0xff]   ;;  %v3327_v20 = vld [vmem:[#allocation5 + $0x490] ss:$24 sps:$4 sm:$0xff]  }
  0xda   : > { %2103 = vmatprep.subr.bf16.mxu0 %v3287_v22  ;;  %1804 = vmatprep.mubr.bf16.mxu1 %v3712_v24  ;;  %v3335_v22 = vld [vmem:[#allocation5 + $0x4c4] ss:$24 sps:$4 sm:$0xff]  }
  0xdb   : > { %2030 = vmatprep.mubr.bf16.mxu0 %v3712_v24  ;;  %v3302_v24 = vld [vmem:[#allocation5 + $0x3cc] ss:$24 sps:$4 sm:$0xff]   ;;  %2272 = vperm.xlu0 %3082, %v2222_v10  }
  0xdc   : > { %1878 = vmatpush1.bf16.msra.mxu1 %v3282_v23  ;;  %v3330_v23 = vld [vmem:[#allocation5 + $0x4b8] ss:$24 sps:$4 sm:$0xff]  }
  0xdd   : > { %2104 = vmatpush1.bf16.msra.mxu0 %v3285_v28  ;;  %1879 = vmatprep.subr.bf16.mxu1 %v3290_v54  ;;  %v2224_v28 = vld [vmem:[%s3862_s10 + $0x50] sm:$0xff]  ;;  %v2225_v54 = vld [vmem:[%s3862_s10 + $0x58] sm:$0xff] }
  0xde   : > { %2105 = vmatprep.subr.bf16.mxu0 %v3293_v31  ;;  %v3339_v31 = vld [vmem:[#allocation5 + $0x4f0] ss:$24 sps:$4 sm:$0xff]  }
  0xdf   : > { %1805 = vmatmul.mubr.bf16.gmra.mrb[36].mxu1 %v3726_v37  ;;  %2282 = vperm.xlu0 %3082, %v2224_v28  }
  0xe0   : > { %2031 = vmatmul.mubr.bf16.gmra.mrb[36].mxu0 %v3726_v37  ;;  %1880 = vmatpush1.bf16.msra.mxu1 %v3288_v32  ;;  %v3308_v37 = vld [vmem:[#allocation5 + $0x3fc] ss:$24 sps:$4 sm:$0xff]  }
  0xe1   : > { %2106 = vmatpush1.bf16.msra.mxu0 %v3291_v17  ;;  %1881 = vmatprep.subr.bf16.mxu1 %v3296_v35  ;;  %v3344_v32 = vld [vmem:[#allocation5 + $0x51c] ss:$24 sps:$4 sm:$0xff]   ;;  %v3342_v35 = vld [vmem:[#allocation5 + $0x518] ss:$24 sps:$4 sm:$0xff]  }
  0xe2   : > { %2107 = vmatprep.subr.bf16.mxu0 %v3299_v36  ;;  %1814 = vmatprep.mubr.bf16.mxu1 %v3732_v44  ;;  %v3347_v17 = vld [vmem:[#allocation5 + $0x524] ss:$24 sps:$4 sm:$0xff]  }
  0xe3   : > { %2040 = vmatprep.mubr.bf16.mxu0 %v3732_v44  ;;  %v2221_v44 = vld [vmem:[%s3862_s10 + $0x38] sm:$0xff]  ;;  %v2226_v36 = vld [vmem:[%s3862_s10 + $0x60] sm:$0xff] }
  0xe4   : > { %1882 = vmatpush1.bf16.msra.mxu1 %v3294_v39  ;;  %2267 = vperm.xlu1 %3083, %v2221_v44   ;;  %v2227_v39 = vld [vmem:[%s3862_s10 + $0x68] sm:$0xff]  ;;  %v3371_v44 = vld [vmem:[#allocation5 + $0x5e4] ss:$24 sps:$4 sm:$0xff]  }
  0xe5   : > { %2108 = vmatpush1.bf16.msra.mxu0 %v3297_v40  ;;  %1883 = vmatprep.subr.bf16.mxu1 %v3302_v24  ;;  %v3350_v40 = vld [vmem:[#allocation5 + $0x54c] ss:$24 sps:$4 sm:$0xff]  }
  0xe6   : > { %2109 = vmatprep.subr.bf16.mxu0 %v3305_v49  ;;  %v3353_v24 = vld [vmem:[#allocation5 + $0x554] ss:$24 sps:$4 sm:$0xff]   ;;  %2292 = vperm.xlu0 %3082, %v2226_v36   ;;  %v3359_v49 = vld [vmem:[#allocation5 + $0x584] ss:$24 sps:$4 sm:$0xff]  }
  0xe7   : > { %1815 = vmatmul.mubr.bf16.gmra.mrb[40].mxu1 %v3746_v59 }
  0xe8   : > { %2041 = vmatmul.mubr.bf16.gmra.mrb[40].mxu0 %v3746_v59  ;;  %1884 = vmatpush1.bf16.msra.mxu1 %v3300_v52  ;;  %v3315_v59 = vld [vmem:[#allocation5 + $0x430] ss:$24 sps:$4 sm:$0xff]  }
  0xe9   : > { %2110 = vmatpush1.bf16.msra.mxu0 %v3303_v53  ;;  %1885 = vmatprep.subr.bf16.mxu1 %v3308_v37  ;;  %v3354_v52 = vld [vmem:[#allocation5 + $0x578] ss:$24 sps:$4 sm:$0xff]  }
  0xea   : > { %2111 = vmatprep.subr.bf16.mxu0 %v3311_v56  ;;  %1824 = vmatprep.mubr.bf16.mxu1 %v3752_v2  ;;  %v2228_v53 = vld [vmem:[%s3862_s10 + $0x70] sm:$0xff]  ;;  %v2229_v37 = vld [vmem:[%s3862_s10 + $0x78] sm:$0xff]  ;;  %v3362_v56 = vld [vmem:[#allocation5 + $0x5ac] ss:$24 sps:$4 sm:$0xff]  }
  0xeb   : > { %2050 = vmatprep.mubr.bf16.mxu0 %v3752_v2  ;;  %v3321_v2 = vld [vmem:[#allocation5 + $0x460] ss:$24 sps:$4 sm:$0xff]   ;;  %2277 = vperm.xlu1 %3083, %v2223_v11  }
  0xec   : > { %1886 = vmatpush1.bf16.msra.mxu1 %v3306_v57  ;;  %v3365_v57 = vld [vmem:[#allocation5 + $0x5b4] ss:$24 sps:$4 sm:$0xff]   ;;  %2302 = vperm.xlu0 %3082, %v2228_v53  }
  0xed   : > { %2112 = vmatpush1.bf16.msra.mxu0 %v3309_v58  ;;  %1887 = vmatprep.subr.bf16.mxu1 %v3314_v0  ;;  %v3360_v58 = vld [vmem:[#allocation5 + $0x5a8] ss:$24 sps:$4 sm:$0xff]   ;;  %v3366_v0 = vld [vmem:[#allocation5 + $0x5d8] ss:$24 sps:$4 sm:$0xff]  }
  0xee   : > { %2113 = vmatprep.subr.bf16.mxu0 %v3317_v1  ;;  %v3369_v1 = vld [vmem:[#allocation5 + $0x5e0] ss:$24 sps:$4 sm:$0xff]  }
  0xef   : > { %1825 = vmatmul.mubr.bf16.gmra.mrb[44].mxu1 %v3766_v15  ;;  %2287 = vperm.xlu1 %3083, %v2225_v54  }
  0xf0   : > { %2051 = vmatmul.mubr.bf16.gmra.mrb[44].mxu0 %v3766_v15  ;;  %1888 = vmatpush1.bf16.msra.mxu1 %v3312_v4  ;;  %v3324_v15 = vld [vmem:[#allocation5 + $0x488] ss:$24 sps:$4 sm:$0xff]  }
  0xf1   : > { %2114 = vmatpush1.bf16.msra.mxu0 %v3315_v59  ;;  %1889 = vmatprep.subr.bf16.mxu1 %v3320_v7 }
  0xf2   : > { %2115 = vmatprep.subr.bf16.mxu0 %v3323_v8  ;;  %1834 = vmatprep.mubr.bf16.mxu1 %v3772_v26 }
  0xf3   : > { %2060 = vmatprep.mubr.bf16.mxu0 %v3772_v26  ;;  %v3333_v26 = vld [vmem:[#allocation5 + $0x4c0] ss:$24 sps:$4 sm:$0xff]   ;;  %2297 = vperm.xlu1 %3083, %v2227_v39  }
  0xf4   : > { %1890 = vmatpush1.bf16.msra.mxu1 %v3318_v9 }
  0xf5   : > { %2116 = vmatpush1.bf16.msra.mxu0 %v3321_v2  ;;  %1891 = vmatprep.subr.bf16.mxu1 %v3326_v12 }
  0xf6   : > { %2117 = vmatprep.subr.bf16.mxu0 %v3329_v19 }
  0xf7   : > { %1835 = vmatmul.mubr.bf16.gmra.mrb[48].mxu1 %v3786_v41  ;;  %2307 = vperm.xlu1 %3083, %v2229_v37  }
  0xf8   : > { %2061 = vmatmul.mubr.bf16.gmra.mrb[48].mxu0 %v3786_v41  ;;  %1892 = vmatpush1.bf16.msra.mxu1 %v3324_v15  ;;  %v3336_v41 = vld [vmem:[#allocation5 + $0x4e8] ss:$24 sps:$4 sm:$0xff]  }
  0xf9   : > { %2118 = vmatpush1.bf16.msra.mxu0 %v3327_v20  ;;  %1893 = vmatprep.subr.bf16.mxu1 %v3332_v21 }
  0xfa   : > { %2119 = vmatprep.subr.bf16.mxu0 %v3335_v22  ;;  %1844 = vmatprep.mubr.bf16.mxu1 %v3792_v50 }
  0xfb   : > { %2070 = vmatprep.mubr.bf16.mxu0 %v3792_v50  ;;  %v3345_v50 = vld [vmem:[#allocation5 + $0x520] ss:$24 sps:$4 sm:$0xff]  }
  0xfc   : > { %1894 = vmatpush1.bf16.msra.mxu1 %v3330_v23 }
  0xfd   : > { %2120 = vmatpush1.bf16.msra.mxu0 %v3333_v26  ;;  %1895 = vmatprep.subr.bf16.mxu1 %v3338_v29 }
  0xfe   : > { %2121 = vmatprep.subr.bf16.mxu0 %v3341_v30 }
  0xff   : > { %1845 = vmatmul.mubr.bf16.gmra.mrb[52].mxu1 %v3806_v5 }
 0x100   : > { %2071 = vmatmul.mubr.bf16.gmra.mrb[52].mxu0 %v3806_v5  ;;  %1896 = vmatpush1.bf16.msra.mxu1 %v3336_v41  ;;  %v3348_v5 = vld [vmem:[#allocation5 + $0x548] ss:$24 sps:$4 sm:$0xff]  }
 0x101   : > { %2122 = vmatpush1.bf16.msra.mxu0 %v3339_v31  ;;  %1897 = vmatprep.subr.bf16.mxu1 %v3344_v32 }
 0x102   : > { %2123 = vmatprep.subr.bf16.mxu0 %v3347_v17  ;;  %1854 = vmatprep.mubr.bf16.mxu1 %v3812_v13 }
 0x103   : > { %2080 = vmatprep.mubr.bf16.mxu0 %v3812_v13  ;;  %v3357_v13 = vld [vmem:[#allocation5 + $0x580] ss:$24 sps:$4 sm:$0xff]  }
 0x104   : > { %1898 = vmatpush1.bf16.msra.mxu1 %v3342_v35 }
 0x105   : > { %2124 = vmatpush1.bf16.msra.mxu0 %v3345_v50  ;;  %1899 = vmatprep.subr.bf16.mxu1 %v3350_v40 }
 0x106   : > { %2125 = vmatprep.subr.bf16.mxu0 %v3353_v24 }
 0x107   : > { %1855 = vmatmul.mubr.bf16.gmra.mrb[56].mxu1 %v3833_v33 }
 0x108   : > { %2081 = vmatmul.mubr.bf16.gmra.mrb[56].mxu0 %v3833_v33  ;;  %1900 = vmatpush1.bf16.msra.mxu1 %v3348_v5  ;;  %v3363_v33 = vld [vmem:[#allocation5 + $0x5b0] ss:$24 sps:$4 sm:$0xff]  }
 0x109   : > { %2126 = vmatpush1.bf16.msra.mxu0 %v3351_v43  ;;  %1901 = vmatprep.subr.bf16.mxu1 %v3356_v46 }
 0x10a   : > { %2127 = vmatprep.subr.bf16.mxu0 %v3359_v49  ;;  %1864 = vmatprep.mubr.bf16.mxu1 %v3839_v47 }
 0x10b   : > { %2090 = vmatprep.mubr.bf16.mxu0 %v3839_v47 }
 0x10c   : > { %1902 = vmatpush1.bf16.msra.mxu1 %v3354_v52 }
 0x10d   : > { %2128 = vmatpush1.bf16.msra.mxu0 %v3357_v13  ;;  %1903 = vmatprep.subr.bf16.mxu1 %v3362_v56 }
 0x10e   : > { %2129 = vmatprep.subr.bf16.mxu0 %v3365_v57 }
 0x10f   : > { %1865 = vmatmul.mubr.bf16.gmra.mrb[60].mxu1 %v3855_v61 }
 0x110   : > { %2091 = vmatmul.mubr.bf16.gmra.mrb[60].mxu0 %v3855_v61  ;;  %1904 = vmatpush1.bf16.msra.mxu1 %v3360_v58 }
 0x111   : > { %2130 = vmatpush1.bf16.msra.mxu0 %v3363_v33  ;;  %1905 = vmatprep.subr.bf16.mxu1 %v3368_v63 }
 0x112   : > { %2131 = vmatprep.subr.bf16.mxu0 %v3371_v44  ;;  %1907 = vmatprep.mubr.bf16.mxu1 %v3696_v55 }
 0x113   : > { %2133 = vmatprep.mubr.bf16.mxu0 %v3696_v55  ;;  %v546_v55 = vlaneseq }
 0x114   : > { %1906 = vmatpush1.bf16.msra.mxu1 %v3366_v0 }
 0x115   : > { %2132 = vmatpush1.bf16.msra.mxu0 %v3369_v1 }
 0x117   : > { %1908 = vmatmul.mubr.bf16.vlgmr.msra.gmra.mrb[32].mxu1 %v3708_v18 }
 0x118   : > { %2134 = vmatmul.mubr.bf16.vlgmr.msra.gmra.mrb[32].mxu0 %v3708_v18  ;;  %1917 = vmatprep.mubr.bf16.mxu1 %v3714_v25  ;;  %v3946_v18 = vshrl.u32 %v546_v55, 7 }
 0x119   : > { %2143 = vmatprep.mubr.bf16.mxu0 %v3714_v25 }
 0x11a   : > { %v548_v25 = vsub.s32 0, %v3946_v18 }
 0x11f   : > { %1918 = vmatmul.mubr.bf16.gmra.mrb[36].mxu1 %v3728_v38 }
 0x120   : > { %2144 = vmatmul.mubr.bf16.gmra.mrb[36].mxu0 %v3728_v38  ;;  %1927 = vmatprep.mubr.bf16.mxu1 %v3734_v45  ;;  %v3952_v38 = vld [vmem:[%s4353_s2] sm:$0x3f] }
 0x121   : > { %2153 = vmatprep.mubr.bf16.mxu0 %v3734_v45  ;;  %v552_v45 = vsub.s32 1, %v3946_v18 }
 0x127   : > { %1928 = vmatmul.mubr.bf16.gmra.mrb[40].mxu1 %v3748_v60 }
 0x128   : > { %2154 = vmatmul.mubr.bf16.gmra.mrb[40].mxu0 %v3748_v60  ;;  %1937 = vmatprep.mubr.bf16.mxu1 %v3754_v3  ;;  %v3956_v60 = vrot.slane %v3952_v38, %v548_v25 }
 0x129   : > { %2163 = vmatprep.mubr.bf16.mxu0 %v3754_v3  ;;  %v3959_v3 = vrot.slane %v3952_v38, %v552_v45 }
 0x12f   : > { %1938 = vmatmul.mubr.bf16.gmra.mrb[44].mxu1 %v3768_v16 }
 0x130   : > { %2164 = vmatmul.mubr.bf16.gmra.mrb[44].mxu0 %v3768_v16  ;;  %1947 = vmatprep.mubr.bf16.mxu1 %v3774_v27 }
 0x131   : > { %2173 = vmatprep.mubr.bf16.mxu0 %v3774_v27 }
 0x137   : > { %1948 = vmatmul.mubr.bf16.gmra.mrb[48].mxu1 %v3788_v42 }
 0x138   : > { %2174 = vmatmul.mubr.bf16.gmra.mrb[48].mxu0 %v3788_v42  ;;  %1957 = vmatprep.mubr.bf16.mxu1 %v3794_v51 }
 0x139   : > { %2183 = vmatprep.mubr.bf16.mxu0 %v3794_v51 }
 0x13a   : > { %v3972_v19 = vpop.permute.xlu1 %2242 }
 0x13f   : > { %1958 = vmatmul.mubr.bf16.gmra.mrb[52].mxu1 %v3808_v6 }
 0x140   : > { %2184 = vmatmul.mubr.bf16.gmra.mrb[52].mxu0 %v3808_v6  ;;  %1967 = vmatprep.mubr.bf16.mxu1 %v3814_v14 }
 0x141   : > { %2193 = vmatprep.mubr.bf16.mxu0 %v3814_v14 }
 0x142   : > { %v3961_v16 = vpop.permute.xlu0 %2232 }
 0x147   : > { %1968 = vmatmul.mubr.bf16.gmra.mrb[56].mxu1 %v3835_v34 }
 0x148   : > { %2194 = vmatmul.mubr.bf16.gmra.mrb[56].mxu0 %v3835_v34  ;;  %1977 = vmatprep.mubr.bf16.mxu1 %v3841_v48 }
 0x149   : > { %2203 = vmatprep.mubr.bf16.mxu0 %v3841_v48 }
 0x14a   : > { %v3968_v9 = vpop.permute.xlu0 %2237 }
 0x14b   : > { %v3986_v36 = vpop.permute.xlu1 %2247 }
 0x14e   : > { %v3992_v46 = vpop.permute.xlu0 %2252 }
 0x14f   : > { %1978 = vmatmul.mubr.bf16.gmra.mrb[60].mxu1 %v3857_v62 }
 0x150   : > { %2204 = vmatmul.mubr.bf16.gmra.mrb[60].mxu0 %v3857_v62 }
 0x152   : > { %v4002_v45 = vpop.permute.xlu1 %2257 }
 0x16a   : > { %v1570_v27 = vpop.f32.mrb[0].mxu1 }
 0x16b   : > { %v1683_v42 = vpop.f32.mrb[0].mxu0  ;;  %v1571_v51 = vadd.f32 %v1570_v27, %v3956_v60  ;;  %v1572_v6 = vpop.f32.mrb[1].mxu1 }
 0x16c   : > { %v1685_v14 = vpop.f32.mrb[1].mxu0  ;;  %v1573_v34 = vadd.f32 %v1572_v6, %v3959_v3  ;;  %v1574_v47 = vpop.f32.mrb[2].mxu1 }
 0x16d   : > { %v1687_v48 = vpop.f32.mrb[2].mxu0  ;;  %v1684_v61 = vadd.f32 %v1683_v42, %v1571_v51  ;;  %v1575_v62 = vadd.f32 %v1574_v47, %v3956_v60  ;;  %v1576_v4 = vpop.f32.mrb[3].mxu1 }
 0x16e   : > { %v1689_v59 = vpop.f32.mrb[3].mxu0  ;;  %v1686_v7 = vadd.f32 %v1685_v14, %v1573_v34  ;;  %v1577_v8 = vadd.f32 %v1576_v4, %v3959_v3  ;;  %v4008_v34 = vpop.permute.xlu0 %2262 }
 0x16f   : > { %v2310_v2 = vmul.f32 %v3961_v16, %v1684_v61  ;;  %v1688_v10 = vadd.f32 %v1687_v48, %v1575_v62 }
 0x170   : > { %v2311_v11 = vmul.f32 %v3961_v16, %v1686_v7  ;;  %v1690_v12 = vadd.f32 %v1689_v59, %v1577_v8 }
 0x171   : > { %2406 = vst [vmem:[%s3974_s26] sm:$0xff] %v2310_v2  ;;  %v2316_v15 = vmul.f32 %v3968_v9, %v1688_v10 }
 0x172   : > { %2407 = vst [vmem:[%s3974_s26 + $0x8] sm:$0xff] %v2311_v11  ;;  %v2317_v20 = vmul.f32 %v3968_v9, %v1690_v12  ;;  %v1580_v21 = vpop.f32.mrb[4].mxu1 }
 0x173   : > { %v1693_v22 = vpop.f32.mrb[4].mxu0  ;;  %2412 = vst [vmem:[%s3974_s26 + $0x30] sm:$0xff] %v2316_v15  ;;  %v1581_v23 = vadd.f32 %v1580_v21, %v3956_v60  ;;  %v1582_v26 = vpop.f32.mrb[5].mxu1 }
 0x174   : > { %v1695_v28 = vpop.f32.mrb[5].mxu0  ;;  %2413 = vst [vmem:[%s3974_s26 + $0x38] sm:$0xff] %v2317_v20  ;;  %v1583_v54 = vadd.f32 %v1582_v26, %v3959_v3  ;;  %v1584_v29 = vpop.f32.mrb[6].mxu1 }
 0x175   : > { %v1697_v30 = vpop.f32.mrb[6].mxu0  ;;  %v1694_v41 = vadd.f32 %v1693_v22, %v1581_v23  ;;  %v1585_v31 = vadd.f32 %v1584_v29, %v3956_v60  ;;  %v1586_v32 = vpop.f32.mrb[7].mxu1 }
 0x176   : > { %v1699_v17 = vpop.f32.mrb[7].mxu0  ;;  %v1696_v35 = vadd.f32 %v1695_v28, %v1583_v54  ;;  %v1587_v50 = vadd.f32 %v1586_v32, %v3959_v3  ;;  %v4018_v22 = vpop.permute.xlu1 %2267 }
 0x177   : > { %v2322_v39 = vmul.f32 %v3972_v19, %v1694_v41  ;;  %v1698_v40 = vadd.f32 %v1697_v30, %v1585_v31  ;;  %v4024_v30 = vpop.permute.xlu0 %2272 }
 0x178   : > { %v2323_v24 = vmul.f32 %v3972_v19, %v1696_v35  ;;  %v1700_v5 = vadd.f32 %v1699_v17, %v1587_v50 }
 0x179   : > { %2418 = vst [vmem:[%s3974_s26 + $0x60] sm:$0xff] %v2322_v39  ;;  %v2328_v43 = vmul.f32 %v3986_v36, %v1698_v40 }
 0x17a   : > { %2419 = vst [vmem:[%s3974_s26 + $0x68] sm:$0xff] %v2323_v24  ;;  %v2329_v49 = vmul.f32 %v3986_v36, %v1700_v5  ;;  %v1590_v52 = vpop.f32.mrb[8].mxu1 }
 0x17b   : > { %v1703_v13 = vpop.f32.mrb[8].mxu0  ;;  %2424 = vst [vmem:[%s3974_s26 + $0x90] sm:$0xff] %v2328_v43  ;;  %v1591_v53 = vadd.f32 %v1590_v52, %v3956_v60  ;;  %v1592_v37 = vpop.f32.mrb[9].mxu1 }
 0x17c   : > { %v1705_v56 = vpop.f32.mrb[9].mxu0  ;;  %2425 = vst [vmem:[%s3974_s26 + $0x98] sm:$0xff] %v2329_v49  ;;  %v1593_v57 = vadd.f32 %v1592_v37, %v3959_v3  ;;  %v1594_v58 = vpop.f32.mrb[10].mxu1 }
 0x17d   : > { %v1707_v33 = vpop.f32.mrb[10].mxu0  ;;  %v1704_v63 = vadd.f32 %v1703_v13, %v1591_v53  ;;  %v1595_v44 = vadd.f32 %v1594_v58, %v3956_v60  ;;  %v1596_v0 = vpop.f32.mrb[11].mxu1 }
 0x17e   : > { %v1709_v1 = vpop.f32.mrb[11].mxu0  ;;  %v1706_v55 = vadd.f32 %v1705_v56, %v1593_v57  ;;  %v1597_v25 = vadd.f32 %v1596_v0, %v3959_v3  ;;  %v4034_v37 = vpop.permute.xlu1 %2277 }
 0x17f   : > { %v1708_v27 = vadd.f32 %v1707_v33, %v1595_v44  ;;  %v2334_v42 = vmul.f32 %v3992_v46, %v1704_v63  ;;  %v4040_v44 = vpop.permute.xlu0 %2282 }
 0x180   : > { %v1710_v51 = vadd.f32 %v1709_v1, %v1597_v25  ;;  %v2335_v6 = vmul.f32 %v3992_v46, %v1706_v55 }
 0x181   : > { %2430 = vst [vmem:[%s3974_s26 + $0xc0] sm:$0xff] %v2334_v42  ;;  %v2340_v14 = vmul.f32 %v4002_v45, %v1708_v27 }
 0x182   : > { %2431 = vst [vmem:[%s3974_s26 + $0xc8] sm:$0xff] %v2335_v6  ;;  %v2341_v47 = vmul.f32 %v4002_v45, %v1710_v51  ;;  %v1600_v48 = vpop.f32.mrb[12].mxu1 }
 0x183   : > { %v1713_v61 = vpop.f32.mrb[12].mxu0  ;;  %2436 = vst [vmem:[%s3974_s26 + $0xf0] sm:$0xff] %v2340_v14  ;;  %v1601_v62 = vadd.f32 %v1600_v48, %v3956_v60  ;;  %v1602_v4 = vpop.f32.mrb[13].mxu1 }
 0x184   : > { %v1715_v59 = vpop.f32.mrb[13].mxu0  ;;  %2437 = vst [vmem:[%s3974_s26 + $0xf8] sm:$0xff] %v2341_v47  ;;  %v1603_v7 = vadd.f32 %v1602_v4, %v3959_v3  ;;  %v1604_v8 = vpop.f32.mrb[14].mxu1 }
 0x185   : > { %v1717_v2 = vpop.f32.mrb[14].mxu0  ;;  %v1714_v10 = vadd.f32 %v1713_v61, %v1601_v62  ;;  %v1605_v11 = vadd.f32 %v1604_v8, %v3956_v60  ;;  %v1606_v12 = vpop.f32.mrb[15].mxu1 }
 0x186   : > { %v1719_v15 = vpop.f32.mrb[15].mxu0  ;;  %v1716_v20 = vadd.f32 %v1715_v59, %v1603_v7  ;;  %v1607_v21 = vadd.f32 %v1606_v12, %v3959_v3  ;;  %v4050_v7 = vpop.permute.xlu1 %2287 }
 0x187   : > { %v1718_v23 = vadd.f32 %v1717_v2, %v1605_v11  ;;  %v2346_v26 = vmul.f32 %v4008_v34, %v1714_v10 }
 0x188   : > { %v1720_v28 = vadd.f32 %v1719_v15, %v1607_v21  ;;  %v2347_v54 = vmul.f32 %v4008_v34, %v1716_v20  ;;  %v4056_v15 = vpop.permute.xlu0 %2292 }
 0x189   : > { %2442 = vst [vmem:[%s3974_s26 + $0x120] sm:$0xff] %v2346_v26  ;;  %v2352_v29 = vmul.f32 %v4018_v22, %v1718_v23 }
 0x18a   : > { %2443 = vst [vmem:[%s3974_s26 + $0x128] sm:$0xff] %v2347_v54  ;;  %v2353_v41 = vmul.f32 %v4018_v22, %v1720_v28  ;;  %v1610_v31 = vpop.f32.mrb[16].mxu1 }
 0x18b   : > { %v1723_v32 = vpop.f32.mrb[16].mxu0  ;;  %2448 = vst [vmem:[%s3974_s26 + $0x150] sm:$0xff] %v2352_v29  ;;  %v1611_v17 = vadd.f32 %v1610_v31, %v3956_v60  ;;  %v1612_v35 = vpop.f32.mrb[17].mxu1 }
 0x18c   : > { %v1725_v50 = vpop.f32.mrb[17].mxu0  ;;  %2449 = vst [vmem:[%s3974_s26 + $0x158] sm:$0xff] %v2353_v41  ;;  %v1613_v39 = vadd.f32 %v1612_v35, %v3959_v3  ;;  %v1614_v40 = vpop.f32.mrb[18].mxu1 }
 0x18d   : > { %v1727_v24 = vpop.f32.mrb[18].mxu0  ;;  %v1724_v5 = vadd.f32 %v1723_v32, %v1611_v17  ;;  %v1615_v43 = vadd.f32 %v1614_v40, %v3956_v60  ;;  %v1616_v49 = vpop.f32.mrb[19].mxu1 }
 0x18e   : > { %v1729_v52 = vpop.f32.mrb[19].mxu0  ;;  %v1726_v13 = vadd.f32 %v1725_v50, %v1613_v39  ;;  %v1617_v53 = vadd.f32 %v1616_v49, %v3959_v3 }
 0x18f   : > { %v1728_v56 = vadd.f32 %v1727_v24, %v1615_v43  ;;  %v2358_v57 = vmul.f32 %v4024_v30, %v1724_v5  ;;  %v4066_v24 = vpop.permute.xlu1 %2297 }
 0x190   : > { %v1730_v58 = vadd.f32 %v1729_v52, %v1617_v53  ;;  %v2359_v33 = vmul.f32 %v4024_v30, %v1726_v13  ;;  %v4072_v53 = vpop.permute.xlu0 %2302 }
 0x191   : > { %2454 = vst [vmem:[%s3974_s26 + $0x180] sm:$0xff] %v2358_v57  ;;  %v2364_v63 = vmul.f32 %v4034_v37, %v1728_v56 }
 0x192   : > { %2455 = vst [vmem:[%s3974_s26 + $0x188] sm:$0xff] %v2359_v33  ;;  %v2365_v0 = vmul.f32 %v4034_v37, %v1730_v58  ;;  %v1620_v1 = vpop.f32.mrb[20].mxu1 }
 0x193   : > { %v1733_v55 = vpop.f32.mrb[20].mxu0  ;;  %2460 = vst [vmem:[%s3974_s26 + $0x1b0] sm:$0xff] %v2364_v63  ;;  %v1621_v25 = vadd.f32 %v1620_v1, %v3956_v60  ;;  %v1622_v27 = vpop.f32.mrb[21].mxu1 }
 0x194   : > { %v1735_v42 = vpop.f32.mrb[21].mxu0  ;;  %2461 = vst [vmem:[%s3974_s26 + $0x1b8] sm:$0xff] %v2365_v0  ;;  %v1623_v51 = vadd.f32 %v1622_v27, %v3959_v3  ;;  %v1624_v6 = vpop.f32.mrb[22].mxu1 }
 0x195   : > { %v1737_v14 = vpop.f32.mrb[22].mxu0  ;;  %v1734_v47 = vadd.f32 %v1733_v55, %v1621_v25  ;;  %v1625_v48 = vadd.f32 %v1624_v6, %v3956_v60  ;;  %v1626_v61 = vpop.f32.mrb[23].mxu1 }
 0x196   : > { %v1739_v62 = vpop.f32.mrb[23].mxu0  ;;  %v1736_v4 = vadd.f32 %v1735_v42, %v1623_v51  ;;  %v1627_v59 = vadd.f32 %v1626_v61, %v3959_v3 }
 0x197   : > { %v1738_v8 = vadd.f32 %v1737_v14, %v1625_v48  ;;  %v2370_v2 = vmul.f32 %v4040_v44, %v1734_v47  ;;  %v4082_v48 = vpop.permute.xlu1 %2307 }
 0x198   : > { %v1740_v10 = vadd.f32 %v1739_v62, %v1627_v59  ;;  %v2371_v11 = vmul.f32 %v4040_v44, %v1736_v4 }
 0x199   : > { %2466 = vst [vmem:[%s3974_s26 + $0x1e0] sm:$0xff] %v2370_v2  ;;  %v2376_v12 = vmul.f32 %v4050_v7, %v1738_v8 }
 0x19a   : > { %2467 = vst [vmem:[%s3974_s26 + $0x1e8] sm:$0xff] %v2371_v11  ;;  %v2377_v20 = vmul.f32 %v4050_v7, %v1740_v10  ;;  %v1630_v21 = vpop.f32.mrb[24].mxu1  ;;  %v560_v10 = vsub.s32 3, %v3946_v18  ;;  %v568_v11 = vsub.s32 5, %v3946_v18 }
 0x19b   : > { %v1743_v23 = vpop.f32.mrb[24].mxu0  ;;  %2472 = vst [vmem:[%s3974_s26 + $0x210] sm:$0xff] %v2376_v12  ;;  %v1631_v26 = vadd.f32 %v1630_v21, %v3956_v60  ;;  %v1632_v28 = vpop.f32.mrb[25].mxu1 }
 0x19c   : > { %v1745_v54 = vpop.f32.mrb[25].mxu0  ;;  %2473 = vst [vmem:[%s3974_s26 + $0x218] sm:$0xff] %v2377_v20  ;;  %v1633_v29 = vadd.f32 %v1632_v28, %v3959_v3  ;;  %v1634_v41 = vpop.f32.mrb[26].mxu1  ;;  %v4103_v21 = vrot.slane %v3952_v38, %v560_v10 }
 0x19d   : > { %v1747_v31 = vpop.f32.mrb[26].mxu0  ;;  %v1744_v32 = vadd.f32 %v1743_v23, %v1631_v26  ;;  %v1635_v17 = vadd.f32 %v1634_v41, %v3956_v60  ;;  %v1636_v35 = vpop.f32.mrb[27].mxu1  ;;  %v4106_v23 = vrot.slane %v3952_v38, %v568_v11 }
 0x19e   : > { %v1749_v50 = vpop.f32.mrb[27].mxu0  ;;  %v1746_v39 = vadd.f32 %v1745_v54, %v1633_v29  ;;  %v1637_v40 = vadd.f32 %v1636_v35, %v3959_v3 }
 0x19f   : > { %v1748_v5 = vadd.f32 %v1747_v31, %v1635_v17  ;;  %v2382_v43 = vmul.f32 %v4056_v15, %v1744_v32 }
 0x1a0   : > { %v1750_v49 = vadd.f32 %v1749_v50, %v1637_v40  ;;  %v2383_v52 = vmul.f32 %v4056_v15, %v1746_v39 }
 0x1a1   : > { %2478 = vst [vmem:[%s3974_s26 + $0x240] sm:$0xff] %v2382_v43  ;;  %v2388_v13 = vmul.f32 %v4066_v24, %v1748_v5 }
 0x1a2   : > { %2479 = vst [vmem:[%s3974_s26 + $0x248] sm:$0xff] %v2383_v52  ;;  %v2389_v56 = vmul.f32 %v4066_v24, %v1750_v49  ;;  %v1640_v57 = vpop.f32.mrb[28].mxu1 }
 0x1a3   : > { %v1753_v58 = vpop.f32.mrb[28].mxu0  ;;  %2484 = vst [vmem:[%s3974_s26 + $0x270] sm:$0xff] %v2388_v13  ;;  %v1641_v33 = vadd.f32 %v1640_v57, %v3956_v60  ;;  %v1642_v63 = vpop.f32.mrb[29].mxu1 }
 0x1a4   : > { %v1755_v0 = vpop.f32.mrb[29].mxu0  ;;  %2485 = vst [vmem:[%s3974_s26 + $0x278] sm:$0xff] %v2389_v56  ;;  %v1643_v1 = vadd.f32 %v1642_v63, %v3959_v3  ;;  %v1644_v55 = vpop.f32.mrb[30].mxu1 }
 0x1a5   : > { %v1757_v25 = vpop.f32.mrb[30].mxu0  ;;  %v1754_v27 = vadd.f32 %v1753_v58, %v1641_v33  ;;  %v1645_v42 = vadd.f32 %v1644_v55, %v3956_v60  ;;  %v1646_v51 = vpop.f32.mrb[31].mxu1  ;;  %v556_v60 = vsub.s32 2, %v3946_v18 }
 0x1a6   : > { %v1759_v6 = vpop.f32.mrb[31].mxu0  ;;  %v1756_v14 = vadd.f32 %v1755_v0, %v1643_v1  ;;  %v1647_v47 = vadd.f32 %v1646_v51, %v3959_v3  ;;  %v564_v3 = vsub.s32 4, %v3946_v18 }
 0x1a7   : > { %v1758_v61 = vadd.f32 %v1757_v25, %v1645_v42  ;;  %v2394_v62 = vmul.f32 %v4072_v53, %v1754_v27  ;;  %v4097_v12 = vrot.slane %v3952_v38, %v556_v60 }
 0x1a8   : > { %v1760_v4 = vadd.f32 %v1759_v6, %v1647_v47  ;;  %v2395_v59 = vmul.f32 %v4072_v53, %v1756_v14  ;;  %v4100_v20 = vrot.slane %v3952_v38, %v564_v3 }
 0x1a9   : > { %2490 = vst [vmem:[%s3974_s26 + $0x2a0] sm:$0xff] %v2394_v62  ;;  %v2400_v8 = vmul.f32 %v4082_v48, %v1758_v61 }
 0x1aa   : > { %2491 = vst [vmem:[%s3974_s26 + $0x2a8] sm:$0xff] %v2395_v59  ;;  %v2401_v2 = vmul.f32 %v4082_v48, %v1760_v4 }
 0x1ab   : > { %2496 = vst [vmem:[%s3974_s26 + $0x2d0] sm:$0xff] %v2400_v8 }
 0x1ac   : > { %2497 = vst [vmem:[%s3974_s26 + $0x2d8] sm:$0xff] %v2401_v2 }
 0x1ea   : > { %v1909_v26 = vpop.f32.mrb[32].mxu1 }
 0x1eb   : > { %v2135_v28 = vpop.f32.mrb[32].mxu0  ;;  %v2888_v54 = vadd.f32 %v1909_v26, %v4097_v12  ;;  %v1911_v41 = vpop.f32.mrb[33].mxu1 }
 0x1ec   : > { %v2920_v29 = vadd.f32 %v2135_v28, %v4100_v20  ;;  %v2137_v18 = vpop.f32.mrb[33].mxu0  ;;  %v2889_v31 = vadd.f32 %v1911_v41, %v4103_v21  ;;  %v1913_v17 = vpop.f32.mrb[34].mxu1 }
 0x1ed   : > { %v2921_v32 = vadd.f32 %v2137_v18, %v4106_v23  ;;  %v2139_v35 = vpop.f32.mrb[34].mxu0  ;;  %v2312_v38 = vmul.f32 %v2888_v54, %v3961_v16  ;;  %v2890_v39 = vadd.f32 %v1913_v17, %v4097_v12  ;;  %v1915_v5 = vpop.f32.mrb[35].mxu1 }
 0x1ee   : > { %v2314_v50 = vmul.f32 %v2920_v29, %v3961_v16  ;;  %v2922_v40 = vadd.f32 %v2139_v35, %v4100_v20  ;;  %v2141_v43 = vpop.f32.mrb[35].mxu0  ;;  %v2313_v49 = vmul.f32 %v2889_v31, %v3961_v16  ;;  %v2891_v13 = vadd.f32 %v1915_v5, %v4103_v21 }
 0x1ef   : > { %v2315_v52 = vmul.f32 %v2921_v32, %v3961_v16  ;;  %v2923_v56 = vadd.f32 %v2141_v43, %v4106_v23  ;;  %2408 = vst [vmem:[%s3974_s26 + $0x10] sm:$0xff] %v2312_v38  ;;  %v2318_v57 = vmul.f32 %v2890_v39, %v3968_v9 }
 0x1f0   : > { %2410 = vst [vmem:[%s3974_s26 + $0x20] sm:$0xff] %v2314_v50  ;;  %v2320_v58 = vmul.f32 %v2922_v40, %v3968_v9  ;;  %2409 = vst [vmem:[%s3974_s26 + $0x18] sm:$0xff] %v2313_v49  ;;  %v2319_v33 = vmul.f32 %v2891_v13, %v3968_v9 }
 0x1f1   : > { %2411 = vst [vmem:[%s3974_s26 + $0x28] sm:$0xff] %v2315_v52  ;;  %v2321_v63 = vmul.f32 %v2923_v56, %v3968_v9  ;;  %2414 = vst [vmem:[%s3974_s26 + $0x40] sm:$0xff] %v2318_v57 }
 0x1f2   : > { %2416 = vst [vmem:[%s3974_s26 + $0x50] sm:$0xff] %v2320_v58  ;;  %2415 = vst [vmem:[%s3974_s26 + $0x48] sm:$0xff] %v2319_v33  ;;  %v1919_v16 = vpop.f32.mrb[36].mxu1 }
 0x1f3   : > { %2417 = vst [vmem:[%s3974_s26 + $0x58] sm:$0xff] %v2321_v63  ;;  %v2145_v0 = vpop.f32.mrb[36].mxu0  ;;  %v2892_v1 = vadd.f32 %v1919_v16, %v4097_v12  ;;  %v1921_v25 = vpop.f32.mrb[37].mxu1 }
 0x1f4   : > { %v2924_v55 = vadd.f32 %v2145_v0, %v4100_v20  ;;  %v2147_v27 = vpop.f32.mrb[37].mxu0  ;;  %v2893_v42 = vadd.f32 %v1921_v25, %v4103_v21  ;;  %v1923_v6 = vpop.f32.mrb[38].mxu1 }
 0x1f5   : > { %v2925_v51 = vadd.f32 %v2147_v27, %v4106_v23  ;;  %v2149_v9 = vpop.f32.mrb[38].mxu0  ;;  %v2324_v14 = vmul.f32 %v2892_v1, %v3972_v19  ;;  %v2894_v61 = vadd.f32 %v1923_v6, %v4097_v12  ;;  %v1925_v4 = vpop.f32.mrb[39].mxu1 }
 0x1f6   : > { %v2326_v47 = vmul.f32 %v2924_v55, %v3972_v19  ;;  %v2926_v62 = vadd.f32 %v2149_v9, %v4100_v20  ;;  %v2151_v59 = vpop.f32.mrb[39].mxu0  ;;  %v2325_v8 = vmul.f32 %v2893_v42, %v3972_v19  ;;  %v2895_v60 = vadd.f32 %v1925_v4, %v4103_v21 }
 0x1f7   : > { %v2327_v2 = vmul.f32 %v2925_v51, %v3972_v19  ;;  %v2927_v3 = vadd.f32 %v2151_v59, %v4106_v23  ;;  %2420 = vst [vmem:[%s3974_s26 + $0x70] sm:$0xff] %v2324_v14  ;;  %v2330_v10 = vmul.f32 %v2894_v61, %v3986_v36 }
 0x1f8   : > { %2422 = vst [vmem:[%s3974_s26 + $0x80] sm:$0xff] %v2326_v47  ;;  %v2332_v11 = vmul.f32 %v2926_v62, %v3986_v36  ;;  %2421 = vst [vmem:[%s3974_s26 + $0x78] sm:$0xff] %v2325_v8  ;;  %v2331_v26 = vmul.f32 %v2895_v60, %v3986_v36 }
 0x1f9   : > { %2423 = vst [vmem:[%s3974_s26 + $0x88] sm:$0xff] %v2327_v2  ;;  %v2333_v28 = vmul.f32 %v2927_v3, %v3986_v36  ;;  %2426 = vst [vmem:[%s3974_s26 + $0xa0] sm:$0xff] %v2330_v10 }
 0x1fa   : > { %2428 = vst [vmem:[%s3974_s26 + $0xb0] sm:$0xff] %v2332_v11  ;;  %2427 = vst [vmem:[%s3974_s26 + $0xa8] sm:$0xff] %v2331_v26  ;;  %v1929_v19 = vpop.f32.mrb[40].mxu1 }
 0x1fb   : > { %2429 = vst [vmem:[%s3974_s26 + $0xb8] sm:$0xff] %v2333_v28  ;;  %v2155_v54 = vpop.f32.mrb[40].mxu0  ;;  %v2896_v29 = vadd.f32 %v1929_v19, %v4097_v12  ;;  %v1931_v18 = vpop.f32.mrb[41].mxu1 }
 0x1fc   : > { %v2928_v41 = vadd.f32 %v2155_v54, %v4100_v20  ;;  %v2157_v31 = vpop.f32.mrb[41].mxu0  ;;  %v2897_v32 = vadd.f32 %v1931_v18, %v4103_v21  ;;  %v1933_v35 = vpop.f32.mrb[42].mxu1 }
 0x1fd   : > { %v2929_v17 = vadd.f32 %v2157_v31, %v4106_v23  ;;  %v2159_v36 = vpop.f32.mrb[42].mxu0  ;;  %v2336_v38 = vmul.f32 %v2896_v29, %v3992_v46  ;;  %v2898_v39 = vadd.f32 %v1933_v35, %v4097_v12  ;;  %v1935_v5 = vpop.f32.mrb[43].mxu1 }
 0x1fe   : > { %v2338_v50 = vmul.f32 %v2928_v41, %v3992_v46  ;;  %v2930_v40 = vadd.f32 %v2159_v36, %v4100_v20  ;;  %v2161_v43 = vpop.f32.mrb[43].mxu0  ;;  %v2337_v49 = vmul.f32 %v2897_v32, %v3992_v46  ;;  %v2899_v13 = vadd.f32 %v1935_v5, %v4103_v21 }
 0x1ff   : > { %v2339_v52 = vmul.f32 %v2929_v17, %v3992_v46  ;;  %v2931_v56 = vadd.f32 %v2161_v43, %v4106_v23  ;;  %2432 = vst [vmem:[%s3974_s26 + $0xd0] sm:$0xff] %v2336_v38  ;;  %v2342_v57 = vmul.f32 %v2898_v39, %v4002_v45 }
 0x200   : > { %2434 = vst [vmem:[%s3974_s26 + $0xe0] sm:$0xff] %v2338_v50  ;;  %v2344_v58 = vmul.f32 %v2930_v40, %v4002_v45  ;;  %2433 = vst [vmem:[%s3974_s26 + $0xd8] sm:$0xff] %v2337_v49  ;;  %v2343_v33 = vmul.f32 %v2899_v13, %v4002_v45 }
 0x201   : > { %2435 = vst [vmem:[%s3974_s26 + $0xe8] sm:$0xff] %v2339_v52  ;;  %v2345_v63 = vmul.f32 %v2931_v56, %v4002_v45  ;;  %2438 = vst [vmem:[%s3974_s26 + $0x100] sm:$0xff] %v2342_v57 }
 0x202   : > { %2440 = vst [vmem:[%s3974_s26 + $0x110] sm:$0xff] %v2344_v58  ;;  %2439 = vst [vmem:[%s3974_s26 + $0x108] sm:$0xff] %v2343_v33  ;;  %v1939_v46 = vpop.f32.mrb[44].mxu1 }
 0x203   : > { %2441 = vst [vmem:[%s3974_s26 + $0x118] sm:$0xff] %v2345_v63  ;;  %v2165_v16 = vpop.f32.mrb[44].mxu0  ;;  %v2900_v0 = vadd.f32 %v1939_v46, %v4097_v12  ;;  %v1941_v55 = vpop.f32.mrb[45].mxu1 }
 0x204   : > { %v2932_v1 = vadd.f32 %v2165_v16, %v4100_v20  ;;  %v2167_v25 = vpop.f32.mrb[45].mxu0  ;;  %v2901_v27 = vadd.f32 %v1941_v55, %v4103_v21  ;;  %v1943_v51 = vpop.f32.mrb[46].mxu1 }
 0x205   : > { %v2933_v42 = vadd.f32 %v2167_v25, %v4106_v23  ;;  %v2169_v45 = vpop.f32.mrb[46].mxu0  ;;  %v2348_v6 = vmul.f32 %v2900_v0, %v4008_v34  ;;  %v2902_v14 = vadd.f32 %v1943_v51, %v4097_v12  ;;  %v1945_v61 = vpop.f32.mrb[47].mxu1 }
 0x206   : > { %v2350_v9 = vmul.f32 %v2932_v1, %v4008_v34  ;;  %v2934_v47 = vadd.f32 %v2169_v45, %v4100_v20  ;;  %v2171_v62 = vpop.f32.mrb[47].mxu0  ;;  %v2349_v4 = vmul.f32 %v2901_v27, %v4008_v34  ;;  %v2903_v8 = vadd.f32 %v1945_v61, %v4103_v21 }
 0x207   : > { %v2351_v59 = vmul.f32 %v2933_v42, %v4008_v34  ;;  %v2935_v2 = vadd.f32 %v2171_v62, %v4106_v23  ;;  %2444 = vst [vmem:[%s3974_s26 + $0x130] sm:$0xff] %v2348_v6  ;;  %v2354_v60 = vmul.f32 %v2902_v14, %v4018_v22 }
 0x208   : > { %2446 = vst [vmem:[%s3974_s26 + $0x140] sm:$0xff] %v2350_v9  ;;  %v2356_v3 = vmul.f32 %v2934_v47, %v4018_v22  ;;  %2445 = vst [vmem:[%s3974_s26 + $0x138] sm:$0xff] %v2349_v4  ;;  %v2355_v10 = vmul.f32 %v2903_v8, %v4018_v22 }
 0x209   : > { %2447 = vst [vmem:[%s3974_s26 + $0x148] sm:$0xff] %v2351_v59  ;;  %v2357_v11 = vmul.f32 %v2935_v2, %v4018_v22  ;;  %2450 = vst [vmem:[%s3974_s26 + $0x160] sm:$0xff] %v2354_v60 }
 0x20a   : > { %2452 = vst [vmem:[%s3974_s26 + $0x170] sm:$0xff] %v2356_v3  ;;  %2451 = vst [vmem:[%s3974_s26 + $0x168] sm:$0xff] %v2355_v10  ;;  %v1949_v34 = vpop.f32.mrb[48].mxu1 }
 0x20b   : > { %2453 = vst [vmem:[%s3974_s26 + $0x178] sm:$0xff] %v2357_v11  ;;  %v2175_v26 = vpop.f32.mrb[48].mxu0  ;;  %v2904_v28 = vadd.f32 %v1949_v34, %v4097_v12  ;;  %v1951_v54 = vpop.f32.mrb[49].mxu1 }
 0x20c   : > { %v2936_v19 = vadd.f32 %v2175_v26, %v4100_v20  ;;  %v2177_v29 = vpop.f32.mrb[49].mxu0  ;;  %v2905_v41 = vadd.f32 %v1951_v54, %v4103_v21  ;;  %v1953_v31 = vpop.f32.mrb[50].mxu1 }
 0x20d   : > { %v2937_v18 = vadd.f32 %v2177_v29, %v4106_v23  ;;  %v2179_v22 = vpop.f32.mrb[50].mxu0  ;;  %v2360_v32 = vmul.f32 %v2904_v28, %v4024_v30  ;;  %v2906_v35 = vadd.f32 %v1953_v31, %v4097_v12  ;;  %v1955_v38 = vpop.f32.mrb[51].mxu1 }
 0x20e   : > { %v2362_v17 = vmul.f32 %v2936_v19, %v4024_v30  ;;  %v2938_v36 = vadd.f32 %v2179_v22, %v4100_v20  ;;  %v2181_v50 = vpop.f32.mrb[51].mxu0  ;;  %v2361_v39 = vmul.f32 %v2905_v41, %v4024_v30  ;;  %v2907_v5 = vadd.f32 %v1955_v38, %v4103_v21 }
 0x20f   : > { %v2363_v40 = vmul.f32 %v2937_v18, %v4024_v30  ;;  %v2939_v43 = vadd.f32 %v2181_v50, %v4106_v23  ;;  %2456 = vst [vmem:[%s3974_s26 + $0x190] sm:$0xff] %v2360_v32  ;;  %v2366_v49 = vmul.f32 %v2906_v35, %v4034_v37 }
 0x210   : > { %2458 = vst [vmem:[%s3974_s26 + $0x1a0] sm:$0xff] %v2362_v17  ;;  %v2368_v52 = vmul.f32 %v2938_v36, %v4034_v37  ;;  %2457 = vst [vmem:[%s3974_s26 + $0x198] sm:$0xff] %v2361_v39  ;;  %v2367_v13 = vmul.f32 %v2907_v5, %v4034_v37 }
 0x211   : > { %2459 = vst [vmem:[%s3974_s26 + $0x1a8] sm:$0xff] %v2363_v40  ;;  %v2369_v56 = vmul.f32 %v2939_v43, %v4034_v37  ;;  %2462 = vst [vmem:[%s3974_s26 + $0x1c0] sm:$0xff] %v2366_v49 }
 0x212   : > { %2464 = vst [vmem:[%s3974_s26 + $0x1d0] sm:$0xff] %v2368_v52  ;;  %2463 = vst [vmem:[%s3974_s26 + $0x1c8] sm:$0xff] %v2367_v13  ;;  %v1959_v30 = vpop.f32.mrb[52].mxu1 }
 0x213   : > { %2465 = vst [vmem:[%s3974_s26 + $0x1d8] sm:$0xff] %v2369_v56  ;;  %v2185_v57 = vpop.f32.mrb[52].mxu0  ;;  %v2908_v58 = vadd.f32 %v1959_v30, %v4097_v12  ;;  %v1961_v63 = vpop.f32.mrb[53].mxu1 }
 0x214   : > { %v2940_v33 = vadd.f32 %v2185_v57, %v4100_v20  ;;  %v2187_v46 = vpop.f32.mrb[53].mxu0  ;;  %v2909_v16 = vadd.f32 %v1961_v63, %v4103_v21  ;;  %v1963_v1 = vpop.f32.mrb[54].mxu1 }
 0x215   : > { %v2941_v0 = vadd.f32 %v2187_v46, %v4106_v23  ;;  %v2189_v37 = vpop.f32.mrb[54].mxu0  ;;  %v2372_v55 = vmul.f32 %v2908_v58, %v4040_v44  ;;  %v2910_v27 = vadd.f32 %v1963_v1, %v4097_v12  ;;  %v1965_v51 = vpop.f32.mrb[55].mxu1 }
 0x216   : > { %v2374_v25 = vmul.f32 %v2940_v33, %v4040_v44  ;;  %v2942_v42 = vadd.f32 %v2189_v37, %v4100_v20  ;;  %v2191_v45 = vpop.f32.mrb[55].mxu0  ;;  %v2373_v6 = vmul.f32 %v2909_v16, %v4040_v44  ;;  %v2911_v14 = vadd.f32 %v1965_v51, %v4103_v21 }
 0x217   : > { %v2375_v9 = vmul.f32 %v2941_v0, %v4040_v44  ;;  %v2943_v47 = vadd.f32 %v2191_v45, %v4106_v23  ;;  %2468 = vst [vmem:[%s3974_s26 + $0x1f0] sm:$0xff] %v2372_v55  ;;  %v2378_v61 = vmul.f32 %v2910_v27, %v4050_v7 }
 0x218   : > { %2470 = vst [vmem:[%s3974_s26 + $0x200] sm:$0xff] %v2374_v25  ;;  %v2380_v62 = vmul.f32 %v2942_v42, %v4050_v7  ;;  %2469 = vst [vmem:[%s3974_s26 + $0x1f8] sm:$0xff] %v2373_v6  ;;  %v2379_v4 = vmul.f32 %v2911_v14, %v4050_v7 }
 0x219   : > { %2471 = vst [vmem:[%s3974_s26 + $0x208] sm:$0xff] %v2375_v9  ;;  %v2381_v59 = vmul.f32 %v2943_v47, %v4050_v7  ;;  %2474 = vst [vmem:[%s3974_s26 + $0x220] sm:$0xff] %v2378_v61 }
 0x21a   : > { %2476 = vst [vmem:[%s3974_s26 + $0x230] sm:$0xff] %v2380_v62  ;;  %2475 = vst [vmem:[%s3974_s26 + $0x228] sm:$0xff] %v2379_v4  ;;  %v1969_v44 = vpop.f32.mrb[56].mxu1 }
 0x21b   : > { %2477 = vst [vmem:[%s3974_s26 + $0x238] sm:$0xff] %v2381_v59  ;;  %v2195_v8 = vpop.f32.mrb[56].mxu0  ;;  %v2912_v2 = vadd.f32 %v1969_v44, %v4097_v12  ;;  %v1971_v3 = vpop.f32.mrb[57].mxu1 }
 0x21c   : > { %v2944_v60 = vadd.f32 %v2195_v8, %v4100_v20  ;;  %v2197_v10 = vpop.f32.mrb[57].mxu0  ;;  %v2913_v11 = vadd.f32 %v1971_v3, %v4103_v21  ;;  %v1973_v26 = vpop.f32.mrb[58].mxu1 }
 0x21d   : > { %v2945_v34 = vadd.f32 %v2197_v10, %v4106_v23  ;;  %v2199_v7 = vpop.f32.mrb[58].mxu0  ;;  %v2384_v28 = vmul.f32 %v2912_v2, %v4056_v15  ;;  %v2914_v54 = vadd.f32 %v1973_v26, %v4097_v12  ;;  %v1975_v41 = vpop.f32.mrb[59].mxu1 }
 0x21e   : > { %v2386_v19 = vmul.f32 %v2944_v60, %v4056_v15  ;;  %v2946_v29 = vadd.f32 %v2199_v7, %v4100_v20  ;;  %v2201_v18 = vpop.f32.mrb[59].mxu0  ;;  %v2385_v31 = vmul.f32 %v2913_v11, %v4056_v15  ;;  %v2915_v32 = vadd.f32 %v1975_v41, %v4103_v21 }
 0x21f   : > { %v2387_v22 = vmul.f32 %v2945_v34, %v4056_v15  ;;  %v2947_v17 = vadd.f32 %v2201_v18, %v4106_v23  ;;  %2480 = vst [vmem:[%s3974_s26 + $0x250] sm:$0xff] %v2384_v28  ;;  %v2390_v35 = vmul.f32 %v2914_v54, %v4066_v24 }
 0x220   : > { %2482 = vst [vmem:[%s3974_s26 + $0x260] sm:$0xff] %v2386_v19  ;;  %v2392_v36 = vmul.f32 %v2946_v29, %v4066_v24  ;;  %2481 = vst [vmem:[%s3974_s26 + $0x258] sm:$0xff] %v2385_v31  ;;  %v2391_v38 = vmul.f32 %v2915_v32, %v4066_v24 }
 0x221   : > { %2483 = vst [vmem:[%s3974_s26 + $0x268] sm:$0xff] %v2387_v22  ;;  %v2393_v50 = vmul.f32 %v2947_v17, %v4066_v24  ;;  %2486 = vst [vmem:[%s3974_s26 + $0x280] sm:$0xff] %v2390_v35 }
 0x222   : > { %2488 = vst [vmem:[%s3974_s26 + $0x290] sm:$0xff] %v2392_v36  ;;  %2487 = vst [vmem:[%s3974_s26 + $0x288] sm:$0xff] %v2391_v38  ;;  %v1979_v15 = vpop.f32.mrb[60].mxu1 }
 0x223   : > { %2489 = vst [vmem:[%s3974_s26 + $0x298] sm:$0xff] %v2393_v50  ;;  %v2205_v39 = vpop.f32.mrb[60].mxu0  ;;  %v2916_v40 = vadd.f32 %v1979_v15, %v4097_v12  ;;  %v1981_v43 = vpop.f32.mrb[61].mxu1 }
 0x224   : > { %v2948_v5 = vadd.f32 %v2205_v39, %v4100_v20  ;;  %v2207_v49 = vpop.f32.mrb[61].mxu0  ;;  %v2917_v52 = vadd.f32 %v1981_v43, %v4103_v21  ;;  %v1983_v13 = vpop.f32.mrb[62].mxu1 }
 0x225   : > { %v2949_v24 = vadd.f32 %v2207_v49, %v4106_v23  ;;  %v2209_v56 = vpop.f32.mrb[62].mxu0  ;;  %v2396_v30 = vmul.f32 %v2916_v40, %v4072_v53  ;;  %v2918_v58 = vadd.f32 %v1983_v13, %v4097_v12  ;;  %v1985_v63 = vpop.f32.mrb[63].mxu1 }
 0x226   : > { %v2398_v57 = vmul.f32 %v2948_v5, %v4072_v53  ;;  %v2950_v33 = vadd.f32 %v2209_v56, %v4100_v20  ;;  %v2211_v46 = vpop.f32.mrb[63].mxu0  ;;  %v2397_v16 = vmul.f32 %v2917_v52, %v4072_v53  ;;  %v2919_v1 = vadd.f32 %v1985_v63, %v4103_v21 }
 0x227   : > { %v2399_v0 = vmul.f32 %v2949_v24, %v4072_v53  ;;  %v2951_v37 = vadd.f32 %v2211_v46, %v4106_v23  ;;  %2492 = vst [vmem:[%s3974_s26 + $0x2b0] sm:$0xff] %v2396_v30  ;;  %v2402_v12 = vmul.f32 %v2918_v58, %v4082_v48 }
 0x228   : > { %2494 = vst [vmem:[%s3974_s26 + $0x2c0] sm:$0xff] %v2398_v57  ;;  %v2404_v20 = vmul.f32 %v2950_v33, %v4082_v48  ;;  %2493 = vst [vmem:[%s3974_s26 + $0x2b8] sm:$0xff] %v2397_v16  ;;  %v2403_v53 = vmul.f32 %v2919_v1, %v4082_v48 }
 0x229   : > { %2495 = vst [vmem:[%s3974_s26 + $0x2c8] sm:$0xff] %v2399_v0  ;;  %v2405_v21 = vmul.f32 %v2951_v37, %v4082_v48  ;;  %2498 = vst [vmem:[%s3974_s26 + $0x2e0] sm:$0xff] %v2402_v12 }
 0x22a   : > { %2500 = vst [vmem:[%s3974_s26 + $0x2f0] sm:$0xff] %v2404_v20  ;;  %2499 = vst [vmem:[%s3974_s26 + $0x2e8] sm:$0xff] %v2403_v53 }
 0x22b   : > { %2501 = vst [vmem:[%s3974_s26 + $0x2f8] sm:$0xff] %v2405_v21 }
 0x22c   : > { %3443 = shalt.err (!%p3440_p9)
}
 0x22d   : > { %s3444_s28 = scalar_lea.hbm %s4297_s13, 12288  ;;  %s3448_s6 = scalar_lea.hbm %s4355_s4, 24576 }
 0x22e   : > { %p3445_p2 = scmp.ne.s32.totalorder %s4297_s13, %s3444_s28  ;;  %p3449_p11 = scmp.lt.u32.totalorder %s4297_s13, %s4355_s4 }
 0x22f   : > { %p3450_p1 = scmp.lt.u32.totalorder %s3448_s6, %s3444_s28  ;;  %p3452_p6 = scmp.lt.u32.totalorder %s3444_s28, %s4297_s13 }
 0x230   : > { %p3446_p0 = pnand %p3445_p2, %p3628_p12 }
 0x231   : > { %p3451_p4 = por %p3450_p1, %p3449_p11 }
 0x232   : > { %p3447_p5 = pneg %p3446_p0 }
 0x233   : > { %p3453_p8 = por %p3452_p6, %p3451_p4 }
 0x235   : > { %p3454_p10 = pnand %p3453_p8, %p3447_p5 }
 0x237   : > { %3457 = shalt.err (!%p3454_p10)
}
 0x238   : > { %s3510_s26 = smov 768   ;;  %s3511_s8 = smov 48  }
 0x239   : > { %3024 = dma.vmem_to_hbm [thread:$0]  (%p3628_p12), %s4299_s25, 12288, %s4297_s13, %s2503_s14, %s3510_s26, %s3510_s26, %s3511_s8  }
 0x23a PF: > { %s2532_s19 = sand.u32 1, %s3488_s15   ;;  %p4371_p13 = scmp.ne.s32.totalorder %s4360_s22, 0 }
 0x23b   : > { %p4372_p3 = scmp.ge.s32.totalorder %s3500_s18, 2  ;;  %s2533_s11 = scalar_lea.sflag [#allocation4], %s2532_s19 }
 0x23d   : > { %p3035_p7 = pnand %p4372_p3, %p4371_p13 }
 0x23f   : > { %3483 = dma.done.wait (!%p3035_p7), %s2533_s11, 12288  }
 0x240   : > { %3485 = vsyncadd (!%p3035_p7), %s2533_s11, 4294955008  ;;  %p18_p9 = scmp.ge.s32.totalorder %s3593_s27, 4   ;;  %s4373_s15 = smov %s3492_s16 }
 0x241   : > { %s4374_s16 = smov %s3496_s17  ;;  %s4375_s17 = smov %s3624_s24 }
 0x242   : > { %s4376_s18 = smov %s3593_s27  ;;  %20 = sbr.rel (!%p18_p9) target bundleno = 6 (0x6), region = 88 }
 0x249   :  { %2538 = vsyncpa [#allocation3], 1 }
 0x24a   :  { %2540 = vsyncpa [#allocation3 + $0x1], 1 }
 0x24b   :  { %2541 = vsyncpa [#allocation6], 1 }
 0x24c   :  { %2542 = vsyncpa [#allocation4], 1 }
 0x24d   :  { %2544 = vsyncpa [#allocation4 + $0x1], 1 }

</bundles_post_ra>
